<compile_context>
chip_gen: v6e
topology: v6e:2x2x1
jax: 0.10.0
libtpu: 0.0.40
codegen_flags: <defaults>
</compile_context>

<pallas_src>
import numpy as np
import jax
import jax.numpy as jnp
from jax.experimental import pallas as pl
from jax.experimental.pallas import tpu as pltpu


# ---------------------------------------------------------------------------
# Fused Pallas kernel (built per static (N, H, W, num_classes) config)
# ---------------------------------------------------------------------------
def build_forward(N, H, W, num_classes):
    assert H % 4 == 0 and W % 4 == 0, "two 2x2 max-pools need H, W divisible by 4"
    C0, C1, C2, C3 = 2, 8, 32, 64
    H1, W1 = H, W
    H2, W2 = H // 2, W // 2
    H3, W3 = H // 4, W // 4
    CH = 3 * 16               # concatenated head hidden width (loc|ori|cls)
    CO = 3 + num_classes      # packed output channels per pixel

    def kernel(x_ref,
               w1_ref, b1_ref, s1_ref, t1_ref,
               w2_ref, b2_ref, s2_ref, t2_ref,
               w3_ref, b3_ref,
               wh1_ref, bh1_ref, wh2_ref, bh2_ref,
               o_ref, a2_ref, a3_ref):
        mm = lambda a, b: jnp.dot(a, b, preferred_element_type=jnp.float32)

        # conv1 (2->8, 3x3, pad=1) + folded BN + ReLU.
        # x_ref: (1, H+2, (W+2)*C0), zero-padded, channel-minor rows.
        acc = mm(x_ref[0, 0:H1, :], w1_ref[0])
        acc = acc + mm(x_ref[0, 1:H1 + 1, :], w1_ref[1])
        acc = acc + mm(x_ref[0, 2:H1 + 2, :], w1_ref[2])
        y1 = jnp.maximum(acc + b1_ref[...], 0.0)                         # (H1, W1*C1)

        # maxpool 2x2 + zero-pad for conv2 (selection matmuls + max)
        r1 = jnp.maximum(mm(s1_ref[0], y1), mm(s1_ref[1], y1))           # (H2+2, W1*C1)
        a2_ref[...] = jnp.maximum(mm(r1, t1_ref[0]), mm(r1, t1_ref[1]))  # (H2+2, (W2+2)*C1)

        # conv2 (8->32) + folded BN + ReLU
        acc = mm(a2_ref[0:H2, :], w2_ref[0])
        acc = acc + mm(a2_ref[1:H2 + 1, :], w2_ref[1])
        acc = acc + mm(a2_ref[2:H2 + 2, :], w2_ref[2])
        y2 = jnp.maximum(acc + b2_ref[...], 0.0)                         # (H2, W2*C2)

        # maxpool 2x2 + zero-pad for conv3
        r2 = jnp.maximum(mm(s2_ref[0], y2), mm(s2_ref[1], y2))           # (H3+2, W2*C2)
        a3_ref[...] = jnp.maximum(mm(r2, t2_ref[0]), mm(r2, t2_ref[1]))  # (H3+2, (W3+2)*C2)

        # conv3 (32->64) + folded BN + ReLU.  Dropout(0.6) -> identity (eval).
        acc = mm(a3_ref[0:H3, :], w3_ref[0])
        acc = acc + mm(a3_ref[1:H3 + 1, :], w3_ref[1])
        acc = acc + mm(a3_ref[2:H3 + 2, :], w3_ref[2])
        feat = jnp.maximum(acc + b3_ref[...], 0.0)                       # (H3, W3*C3)

        # fused heads: per-pixel block-diagonal 2-layer MLP, packed output
        hid = jnp.maximum(mm(feat, wh1_ref[...]) + bh1_ref[...], 0.0)    # (H3, W3*CH)
        out = mm(hid, wh2_ref[...]) + bh2_ref[...]                       # (H3, W3*CO)
        o_ref[0] = out.astype(o_ref.dtype)

    def const(shape):
        return pl.BlockSpec(shape, lambda n, _s=shape: (0,) * len(_s))

    return pl.pallas_call(
        kernel,
        out_shape=jax.ShapeDtypeStruct((N, H3, W3 * CO), jnp.float32),
        grid_spec=pltpu.PrefetchScalarGridSpec(
            num_scalar_prefetch=0,
            grid=(N,),
            in_specs=[
                pl.BlockSpec((1, H1 + 2, (W1 + 2) * C0), lambda n: (n, 0, 0)),
                const((3, (W1 + 2) * C0, W1 * C1)), const((1, W1 * C1)),
                const((2, H2 + 2, H1)), const((2, W1 * C1, (W2 + 2) * C1)),
                const((3, (W2 + 2) * C1, W2 * C2)), const((1, W2 * C2)),
                const((2, H3 + 2, H2)), const((2, W2 * C2, (W3 + 2) * C2)),
                const((3, (W3 + 2) * C2, W3 * C3)), const((1, W3 * C3)),
                const((W3 * C3, W3 * CH)), const((1, W3 * CH)),
                const((W3 * CH, W3 * CO)), const((1, W3 * CO)),
            ],
            out_specs=pl.BlockSpec((1, H3, W3 * CO), lambda n: (n, 0, 0)),
            scratch_shapes=[
                pltpu.VMEM((H2 + 2, (W2 + 2) * C1), jnp.float32),
                pltpu.VMEM((H3 + 2, (W3 + 2) * C2), jnp.float32),
            ],
        ),
        compiler_params=pltpu.CompilerParams(dimension_semantics=("parallel",)),
    )


# ---------------------------------------------------------------------------
# Host-side parameter packing (banded conv mats, pool selection mats, heads)
# ---------------------------------------------------------------------------
def _band_conv(w, scale, shift, w_out):
    """3x3 conv (pad=1) + folded BN scale as 3 banded matmul matrices.

    w: (kh=3, kw=3, cin, cout); band[dy]: ((w_out+2)*cin, w_out*cout);
    bias: (1, w_out*cout) per-pixel additive shift (conv bias + BN folded).
    """
    w = np.asarray(w, np.float32) * np.asarray(scale, np.float32)[None, None, None, :]
    _, _, cin, cout = w.shape
    band = np.zeros((3, (w_out + 2) * cin, w_out * cout), np.float32)
    for dy in range(3):
        for j in range(w_out):
            for dx in range(3):
                band[dy, (j + dx) * cin:(j + dx + 1) * cin,
                     j * cout:(j + 1) * cout] = w[dy, dx]
    bias = np.tile(np.asarray(shift, np.float32), w_out)[None, :]
    return jnp.asarray(band), jnp.asarray(bias)


def _pool_mats(h_in, w_in, c):
    """2x2 max-pool as even/odd selection matrices that also insert the next
    conv layer's zero padding (border rows / channel-groups stay zero)."""
    h2, w2 = h_in // 2, w_in // 2
    s = np.zeros((2, h2 + 2, h_in), np.float32)
    for i in range(h2):
        s[0, i + 1, 2 * i] = 1.0
        s[1, i + 1, 2 * i + 1] = 1.0
    t = np.zeros((2, w_in * c, (w2 + 2) * c), np.float32)
    for j in range(w2):
        for ch in range(c):
            t[0, (2 * j) * c + ch, (j + 1) * c + ch] = 1.0
            t[1, (2 * j + 1) * c + ch, (j + 1) * c + ch] = 1.0
    return jnp.asarray(s), jnp.asarray(t)


def _pack_heads(p, num_classes, w_out):
    """Three 1x1-conv heads -> one per-pixel block-diagonal MLP with a packed
    (loc|ori|cls) output, replicated block-diagonally over w_out pixels."""
    co = 3 + num_classes
    w1 = np.concatenate([np.asarray(p["wl1"]), np.asarray(p["wo1"]),
                         np.asarray(p["wc1"])], axis=1).astype(np.float32)   # (64, 48)
    b1 = np.concatenate([np.asarray(p["bl1"]), np.asarray(p["bo1"]),
                         np.asarray(p["bc1"])]).astype(np.float32)           # (48,)
    w2 = np.zeros((48, co), np.float32)
    w2[0:16, 0:2] = np.asarray(p["wl2"])
    w2[16:32, 2:3] = np.asarray(p["wo2"])
    w2[32:48, 3:] = np.asarray(p["wc2"])
    b2 = np.concatenate([np.asarray(p["bl2"]), np.asarray(p["bo2"]),
                         np.asarray(p["bc2"])]).astype(np.float32)           # (co,)
    bd1 = np.zeros((w_out * 64, w_out * 48), np.float32)
    bd2 = np.zeros((w_out * 48, w_out * co), np.float32)
    for j in range(w_out):
        bd1[j * 64:(j + 1) * 64, j * 48:(j + 1) * 48] = w1
        bd2[j * 48:(j + 1) * 48, j * co:(j + 1) * co] = w2
    return (jnp.asarray(bd1), jnp.asarray(np.tile(b1, w_out)[None, :]),
            jnp.asarray(bd2), jnp.asarray(np.tile(b2, w_out)[None, :]))


def pack_params(p, H, W, num_classes, eps=1e-5):
    packed = {}
    for name, w_out in (("1", W), ("2", W // 2), ("3", W // 4)):
        g = np.asarray(p[f"gamma{name}"], np.float32)
        bta = np.asarray(p[f"beta{name}"], np.float32)
        mu = np.asarray(p[f"mean{name}"], np.float32)
        var = np.asarray(p[f"var{name}"], np.float32)
        scale = g / np.sqrt(var + eps)
        shift = (np.asarray(p[f"b{name}"], np.float32) - mu) * scale + bta
        packed[f"w{name}"], packed[f"b{name}"] = _band_conv(
            p[f"w{name}"], scale, shift, w_out)
    packed["s1"], packed["t1"] = _pool_mats(H, W, 8)
    packed["s2"], packed["t2"] = _pool_mats(H // 2, W // 2, 32)
    (packed["wh1"], packed["bh1"],
     packed["wh2"], packed["bh2"]) = _pack_heads(p, num_classes, W // 4)
    return packed


def init_raw_params(key, num_classes):
    """Random parameters in PyTorch-equivalent layouts.

    NOTE on porting trained weights: a PyTorch Conv2d weight (OIHW) maps to
    the (kh, kw, cin, cout) layout used here as w.transpose(2, 3, 1, 0);
    1x1 head conv weights map to (cin, cout) = w[:, :, 0, 0].T.
    """
    ks = iter(jax.random.split(key, 48))
    rnd = lambda shape, s=0.1: s * jax.random.normal(next(ks), shape, dtype=jnp.float32)
    p = {}
    for name, cin, cout in (("1", 2, 8), ("2", 8, 32), ("3", 32, 64)):
        p[f"w{name}"] = rnd((3, 3, cin, cout))
        p[f"b{name}"] = rnd((cout,))
        p[f"gamma{name}"] = 1.0 + rnd((cout,), 0.05)
        p[f"beta{name}"] = rnd((cout,), 0.05)
        p[f"mean{name}"] = rnd((cout,), 0.05)
        p[f"var{name}"] = 1.0 + jnp.abs(rnd((cout,), 0.05))
    for tag, cout in (("l", 2), ("o", 1), ("c", num_classes)):
        p[f"w{tag}1"] = rnd((64, 16))
        p[f"b{tag}1"] = rnd((16,))
        p[f"w{tag}2"] = rnd((16, cout))
        p[f"b{tag}2"] = rnd((cout,))
    return p


# ---------------------------------------------------------------------------
# Forward wrapper (layout glue only) + pure-JAX reference for validation
# ---------------------------------------------------------------------------
def furniture_layout_cnn(x_nchw, packed, num_classes):
    """x_nchw: (N, 2, H, W) float32 -> (N, (H//4)*(W//4), 3 + num_classes)."""
    N, C0, H, W = x_nchw.shape
    assert C0 == 2
    # NCHW -> zero-padded, row-major / channel-minor 2-D slabs: (N, H+2, (W+2)*2)
    x = jnp.transpose(x_nchw, (0, 2, 3, 1)).astype(jnp.float32)
    x = jnp.pad(x, ((0, 0), (1, 1), (1, 1), (0, 0)))
    x = x.reshape(N, H + 2, (W + 2) * C0)
    fwd = build_forward(N, H, W, num_classes)
    out = fwd(x,
              packed["w1"], packed["b1"], packed["s1"], packed["t1"],
              packed["w2"], packed["b2"], packed["s2"], packed["t2"],
              packed["w3"], packed["b3"],
              packed["wh1"], packed["bh1"], packed["wh2"], packed["bh2"])
    H3, W3 = H // 4, W // 4
    return out.reshape(N, H3 * W3, 3 + num_classes)


def reference_forward(x_nchw, raw, num_classes, eps=1e-5):
    """Pure-JAX/XLA reference of the PyTorch module (eval mode)."""
    hp = jax.lax.Precision.HIGHEST
    x = jnp.transpose(x_nchw, (0, 2, 3, 1)).astype(jnp.float32)

    def conv_bn_relu(x, name):
        y = jax.lax.conv_general_dilated(
            x, raw[f"w{name}"], window_strides=(1, 1), padding="SAME",
            dimension_numbers=("NHWC", "HWIO", "NHWC"), precision=hp)
        y = y + raw[f"b{name}"]
        scale = raw[f"gamma{name}"] / jnp.sqrt(raw[f"var{name}"] + eps)
        y = (y - raw[f"mean{name}"]) * scale + raw[f"beta{name}"]
        return jnp.maximum(y, 0.0)

    def pool(x):
        n, h, w, c = x.shape
        return x.reshape(n, h // 2, 2, w // 2, 2, c).max(axis=(2, 4))

    y = pool(conv_bn_relu(x, "1"))
    y = pool(conv_bn_relu(y, "2"))
    feat = conv_bn_relu(y, "3")

    def head(t):
        h = jnp.maximum(
            jnp.einsum("nhwc,cd->nhwd", feat, raw[f"w{t}1"], precision=hp)
            + raw[f"b{t}1"], 0.0)
        return jnp.einsum("nhwc,cd->nhwd", h, raw[f"w{t}2"], precision=hp) + raw[f"b{t}2"]

    loc, ori, cls = head("l"), head("o"), head("c")
    n, hq, wq, _ = cls.shape
    return jnp.concatenate([loc.reshape(n, hq * wq, 2),
                            ori.reshape(n, hq * wq, 1),
                            cls.reshape(n, hq * wq, num_classes)], axis=-1)


if __name__ == "__main__":
    num_classes = 5
    key = jax.random.PRNGKey(0)
    k_x, k_p = jax.random.split(key)

    # input matching the module: NCHW, 2 channels, small spatial size
    x = jax.random.normal(k_x, (2, 2, 16, 16), dtype=jnp.float32)
    raw = init_raw_params(k_p, num_classes)
    packed = pack_params(raw, 16, 16, num_classes)

    out = furniture_layout_cnn(x, packed, num_classes)
    out = jax.block_until_ready(out)

    expected = (2, (16 // 4) * (16 // 4), 3 + num_classes)
    assert out.shape == expected, (out.shape, expected)
    assert out.dtype == jnp.float32

    ref = jax.block_until_ready(reference_forward(x, raw, num_classes))
    max_err = float(jnp.max(jnp.abs(out - ref)))
    assert max_err < 2e-2, f"mismatch vs reference: max abs err {max_err}"

    print("KERNEL_OK")
</pallas_src>

<mosaic_0001>
module attributes {stable_mosaic.version = 11 : i64} {
  func.func @kernel(%arg0: i32, %arg1: memref<1x18x36xf32, #tpu.memory_space<vmem>>, %arg2: memref<3x36x128xf32, #tpu.memory_space<vmem>>, %arg3: memref<1x128xf32, #tpu.memory_space<vmem>>, %arg4: memref<2x10x16xf32, #tpu.memory_space<vmem>>, %arg5: memref<2x128x80xf32, #tpu.memory_space<vmem>>, %arg6: memref<3x80x256xf32, #tpu.memory_space<vmem>>, %arg7: memref<1x256xf32, #tpu.memory_space<vmem>>, %arg8: memref<2x6x8xf32, #tpu.memory_space<vmem>>, %arg9: memref<2x256x192xf32, #tpu.memory_space<vmem>>, %arg10: memref<3x192x256xf32, #tpu.memory_space<vmem>>, %arg11: memref<1x256xf32, #tpu.memory_space<vmem>>, %arg12: memref<256x192xf32, #tpu.memory_space<vmem>>, %arg13: memref<1x192xf32, #tpu.memory_space<vmem>>, %arg14: memref<192x32xf32, #tpu.memory_space<vmem>>, %arg15: memref<1x32xf32, #tpu.memory_space<vmem>>, %arg16: memref<1x4x32xf32, #tpu.memory_space<vmem>>, %arg17: memref<10x80xf32, #tpu.memory_space<vmem>>, %arg18: memref<6x192xf32, #tpu.memory_space<vmem>>) attributes {dimension_semantics = [#tpu.dimension_semantics<parallel>], iteration_bounds = array<i64: 2>, scalar_prefetch = 0 : i64, scratch_operands = 2 : i64, tpu.core_type = #tpu.core_type<tc>, window_params = [{transform_indices = @transform_0, window_bounds = array<i64: 1, 18, 36>}, {pipeline_mode = #tpu.pipeline_mode<synchronous>, transform_indices = @transform_1, window_bounds = array<i64: 3, 36, 128>}, {pipeline_mode = #tpu.pipeline_mode<synchronous>, transform_indices = @transform_2, window_bounds = array<i64: 1, 128>}, {pipeline_mode = #tpu.pipeline_mode<synchronous>, transform_indices = @transform_3, window_bounds = array<i64: 2, 10, 16>}, {pipeline_mode = #tpu.pipeline_mode<synchronous>, transform_indices = @transform_4, window_bounds = array<i64: 2, 128, 80>}, {pipeline_mode = #tpu.pipeline_mode<synchronous>, transform_indices = @transform_5, window_bounds = array<i64: 3, 80, 256>}, {pipeline_mode = #tpu.pipeline_mode<synchronous>, transform_indices = @transform_6, window_bounds = array<i64: 1, 256>}, {pipeline_mode = #tpu.pipeline_mode<synchronous>, transform_indices = @transform_7, window_bounds = array<i64: 2, 6, 8>}, {pipeline_mode = #tpu.pipeline_mode<synchronous>, transform_indices = @transform_8, window_bounds = array<i64: 2, 256, 192>}, {pipeline_mode = #tpu.pipeline_mode<synchronous>, transform_indices = @transform_9, window_bounds = array<i64: 3, 192, 256>}, {pipeline_mode = #tpu.pipeline_mode<synchronous>, transform_indices = @transform_10, window_bounds = array<i64: 1, 256>}, {pipeline_mode = #tpu.pipeline_mode<synchronous>, transform_indices = @transform_11, window_bounds = array<i64: 256, 192>}, {pipeline_mode = #tpu.pipeline_mode<synchronous>, transform_indices = @transform_12, window_bounds = array<i64: 1, 192>}, {pipeline_mode = #tpu.pipeline_mode<synchronous>, transform_indices = @transform_13, window_bounds = array<i64: 192, 32>}, {pipeline_mode = #tpu.pipeline_mode<synchronous>, transform_indices = @transform_14, window_bounds = array<i64: 1, 32>}, {transform_indices = @transform_15, window_bounds = array<i64: 1, 4, 32>}]} {
    %c0 = arith.constant 0 : index
    %c0_0 = arith.constant 0 : index
    %c0_1 = arith.constant 0 : index
    %0 = vector.load %arg1[%c0, %c0_0, %c0_1] : memref<1x18x36xf32, #tpu.memory_space<vmem>>, vector<1x16x36xf32>
    %1 = vector.shape_cast %0 : vector<1x16x36xf32> to vector<16x36xf32>
    %c0_2 = arith.constant 0 : index
    %c0_3 = arith.constant 0 : index
    %c0_4 = arith.constant 0 : index
    %2 = vector.load %arg2[%c0_2, %c0_3, %c0_4] : memref<3x36x128xf32, #tpu.memory_space<vmem>>, vector<1x36x128xf32>
    %3 = vector.shape_cast %2 : vector<1x36x128xf32> to vector<36x128xf32>
    %cst = arith.constant dense<0.000000e+00> : vector<16x128xf32>
    %4 = tpu.matmul %1, %3, %cst {dimension_numbers = #tpu.dot_dimension_numbers<[1], [0], [0], [1], [0, 0, 1, 1], [], []>} : vector<16x36xf32>, vector<36x128xf32>, vector<16x128xf32> -> vector<16x128xf32>
    %c0_5 = arith.constant 0 : index
    %c1 = arith.constant 1 : index
    %c0_6 = arith.constant 0 : index
    %5 = vector.load %arg1[%c0_5, %c1, %c0_6] : memref<1x18x36xf32, #tpu.memory_space<vmem>>, vector<1x16x36xf32>
    %6 = vector.shape_cast %5 : vector<1x16x36xf32> to vector<16x36xf32>
    %c1_7 = arith.constant 1 : index
    %c0_8 = arith.constant 0 : index
    %c0_9 = arith.constant 0 : index
    %7 = vector.load %arg2[%c1_7, %c0_8, %c0_9] : memref<3x36x128xf32, #tpu.memory_space<vmem>>, vector<1x36x128xf32>
    %8 = vector.shape_cast %7 : vector<1x36x128xf32> to vector<36x128xf32>
    %cst_10 = arith.constant dense<0.000000e+00> : vector<16x128xf32>
    %9 = tpu.matmul %6, %8, %cst_10 {dimension_numbers = #tpu.dot_dimension_numbers<[1], [0], [0], [1], [0, 0, 1, 1], [], []>} : vector<16x36xf32>, vector<36x128xf32>, vector<16x128xf32> -> vector<16x128xf32>
    %10 = arith.addf %4, %9 : vector<16x128xf32>
    %c0_11 = arith.constant 0 : index
    %c2 = arith.constant 2 : index
    %c0_12 = arith.constant 0 : index
    %11 = vector.load %arg1[%c0_11, %c2, %c0_12] : memref<1x18x36xf32, #tpu.memory_space<vmem>>, vector<1x16x36xf32>
    %12 = vector.shape_cast %11 : vector<1x16x36xf32> to vector<16x36xf32>
    %c2_13 = arith.constant 2 : index
    %c0_14 = arith.constant 0 : index
    %c0_15 = arith.constant 0 : index
    %13 = vector.load %arg2[%c2_13, %c0_14, %c0_15] : memref<3x36x128xf32, #tpu.memory_space<vmem>>, vector<1x36x128xf32>
    %14 = vector.shape_cast %13 : vector<1x36x128xf32> to vector<36x128xf32>
    %cst_16 = arith.constant dense<0.000000e+00> : vector<16x128xf32>
    %15 = tpu.matmul %12, %14, %cst_16 {dimension_numbers = #tpu.dot_dimension_numbers<[1], [0], [0], [1], [0, 0, 1, 1], [], []>} : vector<16x36xf32>, vector<36x128xf32>, vector<16x128xf32> -> vector<16x128xf32>
    %16 = arith.addf %10, %15 : vector<16x128xf32>
    %c0_17 = arith.constant 0 : index
    %c0_18 = arith.constant 0 : index
    %17 = vector.load %arg3[%c0_17, %c0_18] : memref<1x128xf32, #tpu.memory_space<vmem>>, vector<1x128xf32>
    %18 = vector.broadcast %17 : vector<1x128xf32> to vector<16x128xf32>
    %19 = arith.addf %16, %18 : vector<16x128xf32>
    %cst_19 = arith.constant 0.000000e+00 : f32
    %20 = vector.broadcast %cst_19 : f32 to vector<16x128xf32>
    %21 = arith.maximumf %19, %20 : vector<16x128xf32>
    %c0_20 = arith.constant 0 : index
    %c0_21 = arith.constant 0 : index
    %c0_22 = arith.constant 0 : index
    %22 = vector.load %arg4[%c0_20, %c0_21, %c0_22] : memref<2x10x16xf32, #tpu.memory_space<vmem>>, vector<1x10x16xf32>
    %23 = vector.shape_cast %22 : vector<1x10x16xf32> to vector<10x16xf32>
    %cst_23 = arith.constant dense<0.000000e+00> : vector<10x128xf32>
    %24 = tpu.matmul %23, %21, %cst_23 {dimension_numbers = #tpu.dot_dimension_numbers<[1], [0], [0], [1], [0, 0, 1, 1], [], []>} : vector<10x16xf32>, vector<16x128xf32>, vector<10x128xf32> -> vector<10x128xf32>
    %c1_24 = arith.constant 1 : index
    %c0_25 = arith.constant 0 : index
    %c0_26 = arith.constant 0 : index
    %25 = vector.load %arg4[%c1_24, %c0_25, %c0_26] : memref<2x10x16xf32, #tpu.memory_space<vmem>>, vector<1x10x16xf32>
    %26 = vector.shape_cast %25 : vector<1x10x16xf32> to vector<10x16xf32>
    %cst_27 = arith.constant dense<0.000000e+00> : vector<10x128xf32>
    %27 = tpu.matmul %26, %21, %cst_27 {dimension_numbers = #tpu.dot_dimension_numbers<[1], [0], [0], [1], [0, 0, 1, 1], [], []>} : vector<10x16xf32>, vector<16x128xf32>, vector<10x128xf32> -> vector<10x128xf32>
    %28 = arith.maximumf %24, %27 : vector<10x128xf32>
    %c0_28 = arith.constant 0 : index
    %c0_29 = arith.constant 0 : index
    %c0_30 = arith.constant 0 : index
    %29 = vector.load %arg5[%c0_28, %c0_29, %c0_30] : memref<2x128x80xf32, #tpu.memory_space<vmem>>, vector<1x128x80xf32>
    %30 = vector.shape_cast %29 : vector<1x128x80xf32> to vector<128x80xf32>
    %cst_31 = arith.constant dense<0.000000e+00> : vector<10x80xf32>
    %31 = tpu.matmul %28, %30, %cst_31 {dimension_numbers = #tpu.dot_dimension_numbers<[1], [0], [0], [1], [0, 0, 1, 1], [], []>} : vector<10x128xf32>, vector<128x80xf32>, vector<10x80xf32> -> vector<10x80xf32>
    %c1_32 = arith.constant 1 : index
    %c0_33 = arith.constant 0 : index
    %c0_34 = arith.constant 0 : index
    %32 = vector.load %arg5[%c1_32, %c0_33, %c0_34] : memref<2x128x80xf32, #tpu.memory_space<vmem>>, vector<1x128x80xf32>
    %33 = vector.shape_cast %32 : vector<1x128x80xf32> to vector<128x80xf32>
    %cst_35 = arith.constant dense<0.000000e+00> : vector<10x80xf32>
    %34 = tpu.matmul %28, %33, %cst_35 {dimension_numbers = #tpu.dot_dimension_numbers<[1], [0], [0], [1], [0, 0, 1, 1], [], []>} : vector<10x128xf32>, vector<128x80xf32>, vector<10x80xf32> -> vector<10x80xf32>
    %35 = arith.maximumf %31, %34 : vector<10x80xf32>
    %c0_36 = arith.constant 0 : index
    %c0_37 = arith.constant 0 : index
    %36 = vector.load %arg17[%c0_36, %c0_37] : memref<10x80xf32, #tpu.memory_space<vmem>>, vector<10x80xf32>
    tpu.vector_store %arg17[%c0_36, %c0_37], %35 {strides = array<i32>} : memref<10x80xf32, #tpu.memory_space<vmem>>, vector<10x80xf32>,
    %c0_38 = arith.constant 0 : index
    %c0_39 = arith.constant 0 : index
    %37 = vector.load %arg17[%c0_38, %c0_39] : memref<10x80xf32, #tpu.memory_space<vmem>>, vector<8x80xf32>
    %c0_40 = arith.constant 0 : index
    %c0_41 = arith.constant 0 : index
    %c0_42 = arith.constant 0 : index
    %38 = vector.load %arg6[%c0_40, %c0_41, %c0_42] : memref<3x80x256xf32, #tpu.memory_space<vmem>>, vector<1x80x256xf32>
    %39 = vector.shape_cast %38 : vector<1x80x256xf32> to vector<80x256xf32>
    %cst_43 = arith.constant dense<0.000000e+00> : vector<8x256xf32>
    %40 = tpu.matmul %37, %39, %cst_43 {dimension_numbers = #tpu.dot_dimension_numbers<[1], [0], [0], [1], [0, 0, 1, 1], [], []>} : vector<8x80xf32>, vector<80x256xf32>, vector<8x256xf32> -> vector<8x256xf32>
    %c1_44 = arith.constant 1 : index
    %c0_45 = arith.constant 0 : index
    %41 = vector.load %arg17[%c1_44, %c0_45] : memref<10x80xf32, #tpu.memory_space<vmem>>, vector<8x80xf32>
    %c1_46 = arith.constant 1 : index
    %c0_47 = arith.constant 0 : index
    %c0_48 = arith.constant 0 : index
    %42 = vector.load %arg6[%c1_46, %c0_47, %c0_48] : memref<3x80x256xf32, #tpu.memory_space<vmem>>, vector<1x80x256xf32>
    %43 = vector.shape_cast %42 : vector<1x80x256xf32> to vector<80x256xf32>
    %cst_49 = arith.constant dense<0.000000e+00> : vector<8x256xf32>
    %44 = tpu.matmul %41, %43, %cst_49 {dimension_numbers = #tpu.dot_dimension_numbers<[1], [0], [0], [1], [0, 0, 1, 1], [], []>} : vector<8x80xf32>, vector<80x256xf32>, vector<8x256xf32> -> vector<8x256xf32>
    %45 = arith.addf %40, %44 : vector<8x256xf32>
    %c2_50 = arith.constant 2 : index
    %c0_51 = arith.constant 0 : index
    %46 = vector.load %arg17[%c2_50, %c0_51] : memref<10x80xf32, #tpu.memory_space<vmem>>, vector<8x80xf32>
    %c2_52 = arith.constant 2 : index
    %c0_53 = arith.constant 0 : index
    %c0_54 = arith.constant 0 : index
    %47 = vector.load %arg6[%c2_52, %c0_53, %c0_54] : memref<3x80x256xf32, #tpu.memory_space<vmem>>, vector<1x80x256xf32>
    %48 = vector.shape_cast %47 : vector<1x80x256xf32> to vector<80x256xf32>
    %cst_55 = arith.constant dense<0.000000e+00> : vector<8x256xf32>
    %49 = tpu.matmul %46, %48, %cst_55 {dimension_numbers = #tpu.dot_dimension_numbers<[1], [0], [0], [1], [0, 0, 1, 1], [], []>} : vector<8x80xf32>, vector<80x256xf32>, vector<8x256xf32> -> vector<8x256xf32>
    %50 = arith.addf %45, %49 : vector<8x256xf32>
    %c0_56 = arith.constant 0 : index
    %c0_57 = arith.constant 0 : index
    %51 = vector.load %arg7[%c0_56, %c0_57] : memref<1x256xf32, #tpu.memory_space<vmem>>, vector<1x256xf32>
    %52 = vector.broadcast %51 : vector<1x256xf32> to vector<8x256xf32>
    %53 = arith.addf %50, %52 : vector<8x256xf32>
    %cst_58 = arith.constant 0.000000e+00 : f32
    %54 = vector.broadcast %cst_58 : f32 to vector<8x256xf32>
    %55 = arith.maximumf %53, %54 : vector<8x256xf32>
    %c0_59 = arith.constant 0 : index
    %c0_60 = arith.constant 0 : index
    %c0_61 = arith.constant 0 : index
    %56 = vector.load %arg8[%c0_59, %c0_60, %c0_61] : memref<2x6x8xf32, #tpu.memory_space<vmem>>, vector<1x6x8xf32>
    %57 = vector.shape_cast %56 : vector<1x6x8xf32> to vector<6x8xf32>
    %cst_62 = arith.constant dense<0.000000e+00> : vector<6x256xf32>
    %58 = tpu.matmul %57, %55, %cst_62 {dimension_numbers = #tpu.dot_dimension_numbers<[1], [0], [0], [1], [0, 0, 1, 1], [], []>} : vector<6x8xf32>, vector<8x256xf32>, vector<6x256xf32> -> vector<6x256xf32>
    %c1_63 = arith.constant 1 : index
    %c0_64 = arith.constant 0 : index
    %c0_65 = arith.constant 0 : index
    %59 = vector.load %arg8[%c1_63, %c0_64, %c0_65] : memref<2x6x8xf32, #tpu.memory_space<vmem>>, vector<1x6x8xf32>
    %60 = vector.shape_cast %59 : vector<1x6x8xf32> to vector<6x8xf32>
    %cst_66 = arith.constant dense<0.000000e+00> : vector<6x256xf32>
    %61 = tpu.matmul %60, %55, %cst_66 {dimension_numbers = #tpu.dot_dimension_numbers<[1], [0], [0], [1], [0, 0, 1, 1], [], []>} : vector<6x8xf32>, vector<8x256xf32>, vector<6x256xf32> -> vector<6x256xf32>
    %62 = arith.maximumf %58, %61 : vector<6x256xf32>
    %c0_67 = arith.constant 0 : index
    %c0_68 = arith.constant 0 : index
    %c0_69 = arith.constant 0 : index
    %63 = vector.load %arg9[%c0_67, %c0_68, %c0_69] : memref<2x256x192xf32, #tpu.memory_space<vmem>>, vector<1x256x192xf32>
    %64 = vector.shape_cast %63 : vector<1x256x192xf32> to vector<256x192xf32>
    %cst_70 = arith.constant dense<0.000000e+00> : vector<6x192xf32>
    %65 = tpu.matmul %62, %64, %cst_70 {dimension_numbers = #tpu.dot_dimension_numbers<[1], [0], [0], [1], [0, 0, 1, 1], [], []>} : vector<6x256xf32>, vector<256x192xf32>, vector<6x192xf32> -> vector<6x192xf32>
    %c1_71 = arith.constant 1 : index
    %c0_72 = arith.constant 0 : index
    %c0_73 = arith.constant 0 : index
    %66 = vector.load %arg9[%c1_71, %c0_72, %c0_73] : memref<2x256x192xf32, #tpu.memory_space<vmem>>, vector<1x256x192xf32>
    %67 = vector.shape_cast %66 : vector<1x256x192xf32> to vector<256x192xf32>
    %cst_74 = arith.constant dense<0.000000e+00> : vector<6x192xf32>
    %68 = tpu.matmul %62, %67, %cst_74 {dimension_numbers = #tpu.dot_dimension_numbers<[1], [0], [0], [1], [0, 0, 1, 1], [], []>} : vector<6x256xf32>, vector<256x192xf32>, vector<6x192xf32> -> vector<6x192xf32>
    %69 = arith.maximumf %65, %68 : vector<6x192xf32>
    %c0_75 = arith.constant 0 : index
    %c0_76 = arith.constant 0 : index
    %70 = vector.load %arg18[%c0_75, %c0_76] : memref<6x192xf32, #tpu.memory_space<vmem>>, vector<6x192xf32>
    tpu.vector_store %arg18[%c0_75, %c0_76], %69 {strides = array<i32>} : memref<6x192xf32, #tpu.memory_space<vmem>>, vector<6x192xf32>,
    %c0_77 = arith.constant 0 : index
    %c0_78 = arith.constant 0 : index
    %71 = vector.load %arg18[%c0_77, %c0_78] : memref<6x192xf32, #tpu.memory_space<vmem>>, vector<4x192xf32>
    %c0_79 = arith.constant 0 : index
    %c0_80 = arith.constant 0 : index
    %c0_81 = arith.constant 0 : index
    %72 = vector.load %arg10[%c0_79, %c0_80, %c0_81] : memref<3x192x256xf32, #tpu.memory_space<vmem>>, vector<1x192x256xf32>
    %73 = vector.shape_cast %72 : vector<1x192x256xf32> to vector<192x256xf32>
    %cst_82 = arith.constant dense<0.000000e+00> : vector<4x256xf32>
    %74 = tpu.matmul %71, %73, %cst_82 {dimension_numbers = #tpu.dot_dimension_numbers<[1], [0], [0], [1], [0, 0, 1, 1], [], []>} : vector<4x192xf32>, vector<192x256xf32>, vector<4x256xf32> -> vector<4x256xf32>
    %c1_83 = arith.constant 1 : index
    %c0_84 = arith.constant 0 : index
    %75 = vector.load %arg18[%c1_83, %c0_84] : memref<6x192xf32, #tpu.memory_space<vmem>>, vector<4x192xf32>
    %c1_85 = arith.constant 1 : index
    %c0_86 = arith.constant 0 : index
    %c0_87 = arith.constant 0 : index
    %76 = vector.load %arg10[%c1_85, %c0_86, %c0_87] : memref<3x192x256xf32, #tpu.memory_space<vmem>>, vector<1x192x256xf32>
    %77 = vector.shape_cast %76 : vector<1x192x256xf32> to vector<192x256xf32>
    %cst_88 = arith.constant dense<0.000000e+00> : vector<4x256xf32>
    %78 = tpu.matmul %75, %77, %cst_88 {dimension_numbers = #tpu.dot_dimension_numbers<[1], [0], [0], [1], [0, 0, 1, 1], [], []>} : vector<4x192xf32>, vector<192x256xf32>, vector<4x256xf32> -> vector<4x256xf32>
    %79 = arith.addf %74, %78 : vector<4x256xf32>
    %c2_89 = arith.constant 2 : index
    %c0_90 = arith.constant 0 : index
    %80 = vector.load %arg18[%c2_89, %c0_90] : memref<6x192xf32, #tpu.memory_space<vmem>>, vector<4x192xf32>
    %c2_91 = arith.constant 2 : index
    %c0_92 = arith.constant 0 : index
    %c0_93 = arith.constant 0 : index
    %81 = vector.load %arg10[%c2_91, %c0_92, %c0_93] : memref<3x192x256xf32, #tpu.memory_space<vmem>>, vector<1x192x256xf32>
    %82 = vector.shape_cast %81 : vector<1x192x256xf32> to vector<192x256xf32>
    %cst_94 = arith.constant dense<0.000000e+00> : vector<4x256xf32>
    %83 = tpu.matmul %80, %82, %cst_94 {dimension_numbers = #tpu.dot_dimension_numbers<[1], [0], [0], [1], [0, 0, 1, 1], [], []>} : vector<4x192xf32>, vector<192x256xf32>, vector<4x256xf32> -> vector<4x256xf32>
    %84 = arith.addf %79, %83 : vector<4x256xf32>
    %c0_95 = arith.constant 0 : index
    %c0_96 = arith.constant 0 : index
    %85 = vector.load %arg11[%c0_95, %c0_96] : memref<1x256xf32, #tpu.memory_space<vmem>>, vector<1x256xf32>
    %86 = vector.broadcast %85 : vector<1x256xf32> to vector<4x256xf32>
    %87 = arith.addf %84, %86 : vector<4x256xf32>
    %cst_97 = arith.constant 0.000000e+00 : f32
    %88 = vector.broadcast %cst_97 : f32 to vector<4x256xf32>
    %89 = arith.maximumf %87, %88 : vector<4x256xf32>
    %c0_98 = arith.constant 0 : index
    %c0_99 = arith.constant 0 : index
    %90 = vector.load %arg12[%c0_98, %c0_99] : memref<256x192xf32, #tpu.memory_space<vmem>>, vector<256x192xf32>
    %cst_100 = arith.constant dense<0.000000e+00> : vector<4x192xf32>
    %91 = tpu.matmul %89, %90, %cst_100 {dimension_numbers = #tpu.dot_dimension_numbers<[1], [0], [0], [1], [0, 0, 1, 1], [], []>} : vector<4x256xf32>, vector<256x192xf32>, vector<4x192xf32> -> vector<4x192xf32>
    %c0_101 = arith.constant 0 : index
    %c0_102 = arith.constant 0 : index
    %92 = vector.load %arg13[%c0_101, %c0_102] : memref<1x192xf32, #tpu.memory_space<vmem>>, vector<1x192xf32>
    %93 = vector.broadcast %92 : vector<1x192xf32> to vector<4x192xf32>
    %94 = arith.addf %91, %93 : vector<4x192xf32>
    %cst_103 = arith.constant 0.000000e+00 : f32
    %95 = vector.broadcast %cst_103 : f32 to vector<4x192xf32>
    %96 = arith.maximumf %94, %95 : vector<4x192xf32>
    %c0_104 = arith.constant 0 : index
    %c0_105 = arith.constant 0 : index
    %97 = vector.load %arg14[%c0_104, %c0_105] : memref<192x32xf32, #tpu.memory_space<vmem>>, vector<192x32xf32>
    %cst_106 = arith.constant dense<0.000000e+00> : vector<4x32xf32>
    %98 = tpu.matmul %96, %97, %cst_106 {dimension_numbers = #tpu.dot_dimension_numbers<[1], [0], [0], [1], [0, 0, 1, 1], [], []>} : vector<4x192xf32>, vector<192x32xf32>, vector<4x32xf32> -> vector<4x32xf32>
    %c0_107 = arith.constant 0 : index
    %c0_108 = arith.constant 0 : index
    %99 = vector.load %arg15[%c0_107, %c0_108] : memref<1x32xf32, #tpu.memory_space<vmem>>, vector<1x32xf32>
    %100 = vector.broadcast %99 : vector<1x32xf32> to vector<4x32xf32>
    %101 = arith.addf %98, %100 : vector<4x32xf32>
    %c0_109 = arith.constant 0 : index
    %c0_110 = arith.constant 0 : index
    %c0_111 = arith.constant 0 : index
    %102 = vector.load %arg16[%c0_109, %c0_110, %c0_111] : memref<1x4x32xf32, #tpu.memory_space<vmem>>, vector<1x4x32xf32>
    %103 = vector.shape_cast %102 : vector<1x4x32xf32> to vector<4x32xf32>
    %104 = vector.shape_cast %101 : vector<4x32xf32> to vector<1x4x32xf32>
    tpu.vector_store %arg16[%c0_109, %c0_110, %c0_111], %104 {strides = array<i32>} : memref<1x4x32xf32, #tpu.memory_space<vmem>>, vector<1x4x32xf32>,
    return
  }
  func.func @transform_0(%arg0: i32) -> (i32, i32, i32) {
    %c0_i32 = arith.constant 0 : i32
    %c0_i32_0 = arith.constant 0 : i32
    %c0_i32_1 = arith.constant 0 : i32
    return %arg0, %c0_i32, %c0_i32_0 : i32, i32, i32
  }
  func.func @transform_1(%arg0: i32) -> (i32, i32, i32) {
    %c0_i32 = arith.constant 0 : i32
    %c0_i32_0 = arith.constant 0 : i32
    %c0_i32_1 = arith.constant 0 : i32
    %c0_i32_2 = arith.constant 0 : i32
    return %c0_i32, %c0_i32_0, %c0_i32_1 : i32, i32, i32
  }
  func.func @transform_2(%arg0: i32) -> (i32, i32) {
    %c0_i32 = arith.constant 0 : i32
    %c0_i32_0 = arith.constant 0 : i32
    %c0_i32_1 = arith.constant 0 : i32
    return %c0_i32, %c0_i32_0 : i32, i32
  }
  func.func @transform_3(%arg0: i32) -> (i32, i32, i32) {
    %c0_i32 = arith.constant 0 : i32
    %c0_i32_0 = arith.constant 0 : i32
    %c0_i32_1 = arith.constant 0 : i32
    %c0_i32_2 = arith.constant 0 : i32
    return %c0_i32, %c0_i32_0, %c0_i32_1 : i32, i32, i32
  }
  func.func @transform_4(%arg0: i32) -> (i32, i32, i32) {
    %c0_i32 = arith.constant 0 : i32
    %c0_i32_0 = arith.constant 0 : i32
    %c0_i32_1 = arith.constant 0 : i32
    %c0_i32_2 = arith.constant 0 : i32
    return %c0_i32, %c0_i32_0, %c0_i32_1 : i32, i32, i32
  }
  func.func @transform_5(%arg0: i32) -> (i32, i32, i32) {
    %c0_i32 = arith.constant 0 : i32
    %c0_i32_0 = arith.constant 0 : i32
    %c0_i32_1 = arith.constant 0 : i32
    %c0_i32_2 = arith.constant 0 : i32
    return %c0_i32, %c0_i32_0, %c0_i32_1 : i32, i32, i32
  }
  func.func @transform_6(%arg0: i32) -> (i32, i32) {
    %c0_i32 = arith.constant 0 : i32
    %c0_i32_0 = arith.constant 0 : i32
    %c0_i32_1 = arith.constant 0 : i32
    return %c0_i32, %c0_i32_0 : i32, i32
  }
  func.func @transform_7(%arg0: i32) -> (i32, i32, i32) {
    %c0_i32 = arith.constant 0 : i32
    %c0_i32_0 = arith.constant 0 : i32
    %c0_i32_1 = arith.constant 0 : i32
    %c0_i32_2 = arith.constant 0 : i32
    return %c0_i32, %c0_i32_0, %c0_i32_1 : i32, i32, i32
  }
  func.func @transform_8(%arg0: i32) -> (i32, i32, i32) {
    %c0_i32 = arith.constant 0 : i32
    %c0_i32_0 = arith.constant 0 : i32
    %c0_i32_1 = arith.constant 0 : i32
    %c0_i32_2 = arith.constant 0 : i32
    return %c0_i32, %c0_i32_0, %c0_i32_1 : i32, i32, i32
  }
  func.func @transform_9(%arg0: i32) -> (i32, i32, i32) {
    %c0_i32 = arith.constant 0 : i32
    %c0_i32_0 = arith.constant 0 : i32
    %c0_i32_1 = arith.constant 0 : i32
    %c0_i32_2 = arith.constant 0 : i32
    return %c0_i32, %c0_i32_0, %c0_i32_1 : i32, i32, i32
  }
  func.func @transform_10(%arg0: i32) -> (i32, i32) {
    %c0_i32 = arith.constant 0 : i32
    %c0_i32_0 = arith.constant 0 : i32
    %c0_i32_1 = arith.constant 0 : i32
    return %c0_i32, %c0_i32_0 : i32, i32
  }
  func.func @transform_11(%arg0: i32) -> (i32, i32) {
    %c0_i32 = arith.constant 0 : i32
    %c0_i32_0 = arith.constant 0 : i32
    %c0_i32_1 = arith.constant 0 : i32
    return %c0_i32, %c0_i32_0 : i32, i32
  }
  func.func @transform_12(%arg0: i32) -> (i32, i32) {
    %c0_i32 = arith.constant 0 : i32
    %c0_i32_0 = arith.constant 0 : i32
    %c0_i32_1 = arith.constant 0 : i32
    return %c0_i32, %c0_i32_0 : i32, i32
  }
  func.func @transform_13(%arg0: i32) -> (i32, i32) {
    %c0_i32 = arith.constant 0 : i32
    %c0_i32_0 = arith.constant 0 : i32
    %c0_i32_1 = arith.constant 0 : i32
    return %c0_i32, %c0_i32_0 : i32, i32
  }
  func.func @transform_14(%arg0: i32) -> (i32, i32) {
    %c0_i32 = arith.constant 0 : i32
    %c0_i32_0 = arith.constant 0 : i32
    %c0_i32_1 = arith.constant 0 : i32
    return %c0_i32, %c0_i32_0 : i32, i32
  }
  func.func @transform_15(%arg0: i32) -> (i32, i32, i32) {
    %c0_i32 = arith.constant 0 : i32
    %c0_i32_0 = arith.constant 0 : i32
    %c0_i32_1 = arith.constant 0 : i32
    return %arg0, %c0_i32, %c0_i32_0 : i32, i32, i32
  }
}

</mosaic_0001>

<bundles_post_ra>
// kernel: tpu_custom_call.1
= control target key start
LH: loop header
LB: loop body
LE: loop exit
PB: predicated region body
PF: predicated region fallthrough
CT: control target
= control target key end

     0   :  { %s4840_s0 = inlined_call_operand.vmem [shape: f32[2,18,36], index: 0, kind: input, shape index: {}]   ;;  %s4841_s1 = inlined_call_operand.vmem [shape: f32[3,36,128], index: 1, kind: input, shape index: {}]   ;;  %s4842_s2 = inlined_call_operand.vmem [shape: f32[1,128], index: 2, kind: input, shape index: {}]   ;;  %s4843_s3 = inlined_call_operand.vmem [shape: f32[2,10,16], index: 3, kind: input, shape index: {}]   ;;  %s4844_s4 = inlined_call_operand.vmem [shape: f32[2,128,80], index: 4, kind: input, shape index: {}]   ;;  %s4845_s5 = inlined_call_operand.vmem [shape: f32[3,80,256], index: 5, kind: input, shape index: {}]   ;;  %s4846_s6 = inlined_call_operand.vmem [shape: f32[1,256], index: 6, kind: input, shape index: {}]   ;;  %s4847_s7 = inlined_call_operand.vmem [shape: f32[2,6,8], index: 7, kind: input, shape index: {}]   ;;  %s4848_s8 = inlined_call_operand.vmem [shape: f32[2,256,192], index: 8, kind: input, shape index: {}]   ;;  %s4849_s9 = inlined_call_operand.vmem [shape: f32[3,192,256], index: 9, kind: input, shape index: {}]   ;;  %s4850_s10 = inlined_call_operand.vmem [shape: f32[1,256], index: 10, kind: input, shape index: {}]   ;;  %s4851_s11 = inlined_call_operand.vmem [shape: f32[256,192], index: 11, kind: input, shape index: {}]   ;;  %s4852_s12 = inlined_call_operand.vmem [shape: f32[1,192], index: 12, kind: input, shape index: {}]   ;;  %s4853_s13 = inlined_call_operand.vmem [shape: f32[192,32], index: 13, kind: input, shape index: {}]   ;;  %s4854_s14 = inlined_call_operand.vmem [shape: f32[1,32], index: 14, kind: input, shape index: {}]   ;;  %s4855_s15 = inlined_call_operand.hbm [shape: f32[2,4,32], index: 15, kind: output, shape index: {}]  }
   0x1   :  { %4860 = sst [smem:[#allocation11_spill]] %s4840_s0 }
   0x2   :  { %4861 = sst [smem:[#allocation12_spill]] %s4841_s1 }
   0x3   :  { %20 = vsyncpa [#allocation5], 0 }
   0x4   :  { %22 = vsyncpa [#allocation5 + $0x1], 0  ;;  %s3242_s18 = smov 0   ;;  %s3244_s19 = smov 0  }
   0x5   :  { %s3246_s20 = smov 0   ;;  %s3248_s21 = smov 0  }
   0x6 LB: > { %4862 = sst [smem:[#allocation7_spill]] %s3154_s20  ;;  %s3263_s22 = sadd.s32 4294967295, %s3158_s21   ;;  %s3158_s21 = sphi %s3248_s21, %s4871_s21   ;;  %s3154_s20 = sphi %s3246_s20, %s4873_s20   ;;  %s3150_s19 = sphi %s3244_s19, %s4875_s19   ;;  %s3146_s18 = sphi %s3242_s18, %s4874_s18  }
   0x7   : > { %s2606_s23 = sadd.s32 4294967294, %s3158_s21   ;;  %s3267_s24 = sadd.s32 1, %s3158_s21  }
   0x8   : > { %4863 = sst [smem:[#allocation8_spill]] %s3267_s24  ;;  %s355_s25 = sadd.s32 1, %s3154_s20 }
   0x9   : > { %s352_s26 = ssub.s32 %s3158_s21, %s3267_s24  ;;  %p365_p0 = scmp.ne.s32.totalorder %s3154_s20, %s3150_s19 }
   0xa   : > { %p353_p1 = scmp.eq.s32.totalorder %s352_s26, 0  ;;  %p366_p2 = scmp.eq.s32.totalorder %s3263_s22, 1 }
   0xb   : > { %p371_p3 = scmp.ne.s32.totalorder %s3150_s19, %s3146_s18  ;;  %p372_p4 = scmp.eq.s32.totalorder %s2606_s23, 1 }
   0xc   : > { %s3278_s27 = scalar_select %p353_p1, %s3154_s20, %s355_s25  }
   0xd   : > { %p3280_p5 = por %p366_p2, %p365_p0  ;;  %p3284_p6 = por %p372_p4, %p371_p3 }
   0xe   : > { %4864 = sst [smem:[#allocation9_spill]] %s3278_s27  ;;  %p2609_p7 = scmp.ge.s32.totalorder %s3158_s21, 1 }
   0xf   : > { %s4866_s29 = scalar_select %p3284_p6, 1, 0 }
  0x10   : > { %p440_p8 = scmp.lt.s32.totalorder %s3158_s21, 3 }
  0x11   : > { %4867 = sst [smem:[#allocation10_spill]] %s4866_s29 }
  0x12   : > { %p441_p9 = pnand %p2609_p7, %p440_p8 }
  0x13   : > { %s4868_s1 = sld [smem:[#allocation12_spill]] (!%p441_p9)  ;;  %p488_p10 = scmp.lt.s32.totalorder (!%p441_p9), %s3263_s22, 1 }
  0x14   : > { %444 = sbr.rel (%p441_p9) target bundleno = 1950 (0x79e), region = 80  ;;  %s4869_s0 = sld [smem:[#allocation11_spill]] (!%p441_p9) }
  0x15   : > { %s2866_s26 = sshll.u32 (!%p441_p9), %s3263_s22, 6 }
  0x16   : > { %s4805_s16 = scalar_lea.hbm (!%p441_p9), %s4855_s15, %s2866_s26 }
  0x19   : > { %v2616_v0 = vld [vmem:[%s4868_s1 + $0x48] sm:$0xf]  ;;  %vm515_vm0 = vcmask 1043456   ;;  %v2615_v1 = vld [vmem:[%s4868_s1 + $0x40] sm:$0xff]  ;;  %v2614_v2 = vld [vmem:[%s4868_s1 + $0x38] sm:$0xff]  ;;  %s489_s27 = scalar_select %p488_p10, %s3263_s22, 1 }
  0x1a   : > { %2934 = vmatprep.subr.msk.mxu1 %vm515_vm0, %v2616_v0  ;;  %v2627_v3 = vld [vmem:[%s4868_s1 + $0x70] sm:$0xf]  ;;  %v2626_v4 = vld [vmem:[%s4868_s1 + $0x68] sm:$0xff]  ;;  %v2625_v6 = vld [vmem:[%s4868_s1 + $0x60] sm:$0xff]  ;;  %vm508_vm1 = vcmask 293888   ;;  %vm785_vm2 = vcmask 130048  }
  0x1b   : > { %2935 = vmatpush3.msk.msra.mxu1 %vm515_vm0, %v2616_v0  ;;  %2960 = vmatprep.subr.msk.mxu0 %vm515_vm0, %v2627_v3  ;;  %v2613_v5 = vld [vmem:[%s4868_s1 + $0x30] sm:$0xff]  ;;  %s3057_s29 = smul.u32 24, %s489_s27  ;;  %v2612_v7 = vld [vmem:[%s4868_s1 + $0x28] sm:$0xff]  ;;  %v2624_v9 = vld [vmem:[%s4868_s1 + $0x58] sm:$0xff]  ;;  %vm1140_vm3 = vcmask 648192   ;;  %vm1138_vm4 = vcmask 654336  }
  0x1c   : > { %2936 = vmatprep.subr.mxu1 %v2615_v1  ;;  %2961 = vmatpush3.msk.msra.mxu0 %vm515_vm0, %v2627_v3  ;;  %v499_v11 = vld [vmem:[%s4868_s1 + $0x20] sm:$0xf]  ;;  %v498_v12 = vld [vmem:[%s4868_s1 + $0x18] sm:$0xff]  ;;  %v2623_v13 = vld [vmem:[%s4868_s1 + $0x50] sm:$0xff]  ;;  %vm1448_vm5 = vcmask 64512   ;;  %vm1875_vm6 = vcmask 521216  }
  0x1d   : > { %2937 = vmatpush3.msra.mxu1 %v2615_v1  ;;  %2962 = vmatprep.subr.mxu0 %v2626_v4  ;;  %s3323_s17 = scalar_lea.vmem %s4869_s0, %s3057_s29  ;;  %v497_v15 = vld [vmem:[%s4868_s1 + $0x10] sm:$0xff]  ;;  %v496_v17 = vld [vmem:[%s4868_s1 + $0x8] sm:$0xff]  ;;  %v495_v19 = vld [vmem:[%s4868_s1] sm:$0xff]  ;;  %vm1983_vm7 = vcmask 523264   ;;  %s485_s27 = sand.u32 1, %s3150_s19   ;;  %vm2531_vm8 = vcmask 257024  }
  0x1e   : > { %2938 = vmatprep.subr.mxu1 %v2614_v2  ;;  %2963 = vmatpush3.msra.mxu0 %v2626_v4  ;;  %v500_v8 = vld [vmem:[%s3323_s17 + $0x1] sm:$0xff]  ;;  %v501_v10 = vld [vmem:[%s3323_s17 + $0x9] sm:$0xff]  ;;  %v2653_v22 = vld [vmem:[%s4844_s4 + $0xf8] sm:$0xff]  ;;  %s2610_s23 = sshll.u32 %s485_s27, 2  ;;  %s2534_s0 = scalar_lea.sflag [#allocation5], %s485_s27 }
  0x1f   : > { %2939 = vmatpush3.msra.mxu1 %v2614_v2  ;;  %2964 = vmatprep.subr.mxu0 %v2625_v6  ;;  %v493_v14 = vld [vmem:[%s3323_s17] sm:$0xff]  ;;  %v679_v18 = vld [vmem:[%s3323_s17 + $0xa] sm:$0xff]  ;;  %v2649_v26 = vld [vmem:[%s4844_s4 + $0xd8] sm:$0xff]  ;;  %s487_s29 = scalar_lea.vmem [#allocation4], %s2610_s23  ;;  %s3161_s22 = smov [#allocation4]  }
  0x20   : > { %2940 = vmatprep.subr.mxu1 %v2613_v5  ;;  %2944 = vmatprep.mubr.msk.f32.mxu1 %vm508_vm1, %v500_v8  ;;  %v678_v16 = vld [vmem:[%s3323_s17 + $0x2] sm:$0xff]  ;;  %v2652_v23 = vld [vmem:[%s4844_s4 + $0xf0] sm:$0xff]  ;;  %v2645_v30 = vld [vmem:[%s4844_s4 + $0xb8] sm:$0xff]  ;;  %s2547_s20 = sshll.u32 %s487_s29, 4  ;;  %s3102_s23 = sshll.u32 %s3161_s22, 4  ;;  %s2548_s20 = int_to_ptr.vmem [resolvable:$true] %s2547_s20  ;;  %s3103_s23 = int_to_ptr.vmem [resolvable:$false] %s3102_s23 }
  0x21   : > { %2941 = vmatpush3.msra.mxu1 %v2613_v5  ;;  %2965 = vmatpush3.msra.mxu0 %v2625_v6  ;;  %v494_v20 = vld [vmem:[%s3323_s17 + $0x8] sm:$0xff]  ;;  %v783_v21 = vld [vmem:[%s4843_s3] sm:$0xff]  ;;  %v2648_v27 = vld [vmem:[%s4844_s4 + $0xd0] sm:$0xff]  ;;  %s3098_s1 = scalar_lea.vmem %s2548_s20, 64  ;;  %s3104_s17 = scalar_lea.vmem %s3103_s23, 128 }
  0x22   : > { %2942 = vmatprep.subr.mxu1 %v2612_v7  ;;  %2966 = vmatprep.subr.mxu0 %v2624_v9  ;;  %v2651_v24 = vld [vmem:[%s4844_s4 + $0xe8] sm:$0xff]  ;;  %v2650_v25 = vld [vmem:[%s4844_s4 + $0xe0] sm:$0xff]  ;;  %v2644_v31 = vld [vmem:[%s4844_s4 + $0xb0] sm:$0xff]  ;;  %p3099_p11 = scmp.ne.s32.totalorder %s2548_s20, %s3098_s1  ;;  %p3105_p0 = scmp.lt.s32.totalorder %s2548_s20, %s3103_s23 }
  0x23   : > { %2943 = vmatpush3.msra.mxu1 %v2612_v7  ;;  %2967 = vmatpush3.msra.mxu0 %v2624_v9  ;;  %v2647_v28 = vld [vmem:[%s4844_s4 + $0xc8] sm:$0xff]  ;;  %v2646_v29 = vld [vmem:[%s4844_s4 + $0xc0] sm:$0xff]  ;;  %v2634_v49 = vld [vmem:[%s4843_s3 + $0x10] sm:$0xff]  ;;  %p3106_p1 = scmp.lt.s32.totalorder %s3104_s17, %s3098_s1 }
  0x24   : > { %2945 = vmatmul.mubr.msk.f32.vlgmr.msra.gmra.mxu1 %vm508_vm1, %v501_v10  ;;  %2947 = vmatprep.subr.msk.mxu1 %vm515_vm0, %v499_v11  ;;  %v2643_v32 = vld [vmem:[%s4844_s4 + $0xa8] sm:$0xff]  ;;  %v2631_v38 = vld [vmem:[%s4842_s2] ss:$0 sm:$0xff]  ;;  %v2635_v50 = vld [vmem:[%s4843_s3 + $0x18] sm:$0x3]  ;;  %p3100_p12 = pnand %p3099_p11, %p3280_p5 }
  0x25   : > { %2948 = vmatpush3.msk.msra.mxu1 %vm515_vm0, %v499_v11  ;;  %2968 = vmatprep.subr.mxu0 %v2623_v13  ;;  %v784_v48 = vld [vmem:[%s4843_s3 + $0x8] sm:$0x3]  ;;  %v968_v51 = vld [vmem:[%s4844_s4 + $0x78] sm:$0xff]  ;;  %v967_v52 = vld [vmem:[%s4844_s4 + $0x70] sm:$0xff]  ;;  %p3107_p2 = por %p3106_p1, %p3105_p0 }
  0x26   : > { %2949 = vmatprep.subr.mxu1 %v498_v12  ;;  %2957 = vmatprep.mubr.msk.f32.mxu1 %vm508_vm1, %v493_v14  ;;  %v966_v53 = vld [vmem:[%s4844_s4 + $0x68] sm:$0xff]  ;;  %v965_v54 = vld [vmem:[%s4844_s4 + $0x60] sm:$0xff]  ;;  %v964_v55 = vld [vmem:[%s4844_s4 + $0x58] sm:$0xff]  ;;  %p3101_p13 = pneg %p3100_p12 }
  0x27   : > { %2950 = vmatpush3.msra.mxu1 %v498_v12  ;;  %2969 = vmatpush3.msra.mxu0 %v2623_v13  ;;  %v963_v56 = vld [vmem:[%s4844_s4 + $0x50] sm:$0xff]  ;;  %v962_v57 = vld [vmem:[%s4844_s4 + $0x48] sm:$0xff]  ;;  %v961_v58 = vld [vmem:[%s4844_s4 + $0x40] sm:$0xff] }
  0x28   : > { %2951 = vmatprep.subr.mxu1 %v497_v15  ;;  %2970 = vmatprep.mubr.msk.f32.mxu0 %vm508_vm1, %v678_v16  ;;  %v960_v59 = vld [vmem:[%s4844_s4 + $0x38] sm:$0xff]  ;;  %v959_v60 = vld [vmem:[%s4844_s4 + $0x30] sm:$0xff]  ;;  %v958_v61 = vld [vmem:[%s4844_s4 + $0x28] sm:$0xff]  ;;  %p3108_p3 = pnand %p3107_p2, %p3101_p13 }
  0x29   : > { %2952 = vmatpush3.msra.mxu1 %v497_v15  ;;  %2971 = vmatmul.mubr.msk.f32.vlgmr.msra.gmra.mxu0 %vm508_vm1, %v679_v18  ;;  %v957_v62 = vld [vmem:[%s4844_s4 + $0x20] sm:$0xff]  ;;  %v956_v0 = vld [vmem:[%s4844_s4 + $0x18] sm:$0xff]  ;;  %v955_v2 = vld [vmem:[%s4844_s4 + $0x10] sm:$0xff] }
  0x2a   : > { %2953 = vmatprep.subr.mxu1 %v496_v17  ;;  %3022 = vmatprep.subr.mxu0 %v2653_v22  ;;  %v2642_v63 = vld [vmem:[%s4844_s4 + $0xa0] sm:$0xff]  ;;  %v2641_v1 = vld [vmem:[%s4844_s4 + $0x98] sm:$0xff]  ;;  %v2640_v3 = vld [vmem:[%s4844_s4 + $0x90] sm:$0xff] }
  0x2b   : > { %2954 = vmatpush3.msra.mxu1 %v496_v17  ;;  %3023 = vmatpush3.msra.mxu0 %v2653_v22  ;;  %v954_v4 = vld [vmem:[%s4844_s4 + $0x8] sm:$0xff]  ;;  %v953_v6 = vld [vmem:[%s4844_s4] sm:$0xff]  ;;  %v2673_v8 = vld [vmem:[%s4845_s5 + $0x138] sm:$0xff] }
  0x2c   : > { %2955 = vmatprep.subr.mxu1 %v495_v19  ;;  %3024 = vmatprep.subr.mxu0 %v2652_v23  ;;  %v2639_v5 = vld [vmem:[%s4844_s4 + $0x88] sm:$0xff]  ;;  %v2638_v7 = vld [vmem:[%s4844_s4 + $0x80] sm:$0xff]  ;;  %v1162_v9 = vld [vmem:[%s4845_s5 + $0x98] sm:$0xff] }
  0x2d   : > { %2956 = vmatpush3.msra.mxu1 %v495_v19  ;;  %3025 = vmatpush3.msra.mxu0 %v2652_v23  ;;  %v2672_v16 = vld [vmem:[%s4845_s5 + $0x130] sm:$0xff]  ;;  %v2671_v18 = vld [vmem:[%s4845_s5 + $0x128] sm:$0xff]  ;;  %v2669_v22 = vld [vmem:[%s4845_s5 + $0x118] sm:$0xff] }
  0x2e   : > { %2958 = vmatmul.mubr.msk.f32.vlgmr.msra.gmra.mxu1 %vm508_vm1, %v494_v20  ;;  %3026 = vmatprep.subr.mxu0 %v2651_v24  ;;  %v1161_v17 = vld [vmem:[%s4845_s5 + $0x90] sm:$0xff]  ;;  %v1160_v19 = vld [vmem:[%s4845_s5 + $0x88] sm:$0xff]  ;;  %v2670_v20 = vld [vmem:[%s4845_s5 + $0x120] sm:$0xff] }
  0x2f   : > { %2977 = vmatprep.mubr.msk.f32.mxu1 %vm785_vm2, %v783_v21  ;;  %3027 = vmatpush3.msra.mxu0 %v2651_v24  ;;  %v1159_v21 = vld [vmem:[%s4845_s5 + $0x80] sm:$0xff]  ;;  %v1158_v23 = vld [vmem:[%s4845_s5 + $0x78] sm:$0xff]  ;;  %v2668_v24 = vld [vmem:[%s4845_s5 + $0x110] sm:$0xff] }
  0x30   : > { %3028 = vmatprep.subr.mxu0 %v2650_v25 }
  0x31   : > { %3029 = vmatpush3.msra.mxu0 %v2650_v25  ;;  %v1157_v25 = vld [vmem:[%s4845_s5 + $0x70] sm:$0xff] }
  0x32   : > { %3030 = vmatprep.subr.mxu0 %v2649_v26 }
  0x33   : > { %3031 = vmatpush3.msra.mxu0 %v2649_v26  ;;  %v2667_v26 = vld [vmem:[%s4845_s5 + $0x108] sm:$0xff] }
  0x34   : > { %3032 = vmatprep.subr.mxu0 %v2648_v27 }
  0x35   : > { %3033 = vmatpush3.msra.mxu0 %v2648_v27  ;;  %v1156_v27 = vld [vmem:[%s4845_s5 + $0x68] sm:$0xff] }
  0x36   : > { %3034 = vmatprep.subr.mxu0 %v2647_v28 }
  0x37   : > { %3035 = vmatpush3.msra.mxu0 %v2647_v28  ;;  %v2666_v28 = vld [vmem:[%s4845_s5 + $0x100] sm:$0xff] }
  0x38   : > { %3036 = vmatprep.subr.mxu0 %v2646_v29 }
  0x39   : > { %3037 = vmatpush3.msra.mxu0 %v2646_v29  ;;  %v2665_v29 = vld [vmem:[%s4845_s5 + $0xf8] sm:$0xff] }
  0x3a   : > { %3038 = vmatprep.subr.mxu0 %v2645_v30 }
  0x3b   : > { %3039 = vmatpush3.msra.mxu0 %v2645_v30  ;;  %v1155_v30 = vld [vmem:[%s4845_s5 + $0x60] sm:$0xff] }
  0x3c   : > { %3040 = vmatprep.subr.mxu0 %v2644_v31 }
  0x3d   : > { %3041 = vmatpush3.msra.mxu0 %v2644_v31  ;;  %v2664_v31 = vld [vmem:[%s4845_s5 + $0xf0] sm:$0xff] }
  0x3e   : > { %3042 = vmatprep.subr.mxu0 %v2643_v32 }
  0x3f   : > { %3043 = vmatpush3.msra.mxu0 %v2643_v32  ;;  %v1154_v32 = vld [vmem:[%s4845_s5 + $0x58] sm:$0xff] }
  0x40   : > { %3044 = vmatprep.subr.mxu0 %v2642_v63 }
  0x41   : > { %3045 = vmatpush3.msra.mxu0 %v2642_v63 }
  0x42   : > { %3046 = vmatprep.subr.mxu0 %v2641_v1 }
  0x43   : > { %3047 = vmatpush3.msra.mxu0 %v2641_v1  ;;  %v2693_v1 = vld [vmem:[%s4845_s5 + $0x1c8] sm:$0xff] }
  0x44   : > { %3048 = vmatprep.subr.mxu0 %v2640_v3 }
  0x45   : > { %3049 = vmatpush3.msra.mxu0 %v2640_v3  ;;  %v2691_v3 = vld [vmem:[%s4845_s5 + $0x1b8] sm:$0xff] }
  0x46   : > { %3050 = vmatprep.subr.mxu0 %v2639_v5 }
  0x47   : > { %3051 = vmatpush3.msra.mxu0 %v2639_v5  ;;  %v2689_v5 = vld [vmem:[%s4845_s5 + $0x1a8] sm:$0xff] }
  0x48   : > { %3052 = vmatprep.subr.mxu0 %v2638_v7 }
  0x49   : > { %3053 = vmatpush3.msra.mxu0 %v2638_v7  ;;  %v2687_v7 = vld [vmem:[%s4845_s5 + $0x198] sm:$0xff] }
  0x4a   : > { %1274 = vmatprep.subr.mxu0 %v1162_v9  ;;  %v2685_v9 = vld [vmem:[%s4845_s5 + $0x188] sm:$0xff] }
  0xe4   : > { %v2946_v33 = vpop.f32.mrf.mxu1 }
  0xe6   : > { %v585_v34 = vpop.f32.mrf.mxu1 }
  0xe9   : > { %v2972_v36 = vpop.f32.mrf.mxu0 }
  0xeb   : > { %v761_v42 = vpop.f32.mrf.mxu0 }
  0xee   : > { %v2959_v35 = vpop.f32.mrf.mxu1 }
  0xef   : > { %v675_v37 = vadd.f32 %v2959_v35, %v2946_v33  ;;  %v2663_v33 = vld [vmem:[%s4845_s5 + $0xe8] sm:$0xff]  ;;  %v2662_v35 = vld [vmem:[%s4845_s5 + $0xe0] sm:$0xff] }
  0xf0   : > { %v669_v39 = vpop.f32.mrf.mxu1 }
  0xf1   : > { %v771_v40 = vadd.f32 %v2972_v36, %v675_v37  ;;  %v670_v41 = vadd.f32 %v669_v39, %v585_v34  ;;  %v1153_v34 = vld [vmem:[%s4845_s5 + $0x50] sm:$0xff]  ;;  %v1152_v36 = vld [vmem:[%s4845_s5 + $0x48] sm:$0xff]  ;;  %v2661_v37 = vld [vmem:[%s4845_s5 + $0xd8] sm:$0xff] }
  0xf2   : > { %v2660_v39 = vld [vmem:[%s4845_s5 + $0xd0] sm:$0xff] }
  0xf3   : > { %v780_v43 = vadd.f32 %v2631_v38, %v771_v40  ;;  %v770_v44 = vadd.f32 %v761_v42, %v670_v41  ;;  %v1150_v40 = vld [vmem:[%s4845_s5 + $0x38] sm:$0xff]  ;;  %v2659_v41 = vld [vmem:[%s4845_s5 + $0xc8] sm:$0xff]  ;;  %v1149_v42 = vld [vmem:[%s4845_s5 + $0x30] sm:$0xff] }
  0xf5   : > { %v782_v45 = vmax.f32 %v780_v43, 0.0  ;;  %v779_v46 = vadd.f32 %v2631_v38, %v770_v44  ;;  %v1151_v38 = vld [vmem:[%s4845_s5 + $0x40] sm:$0xff]  ;;  %v1148_v44 = vld [vmem:[%s4845_s5 + $0x28] sm:$0xff] }
  0xf6   : > { %v2658_v43 = vld [vmem:[%s4845_s5 + $0xc0] sm:$0xff] }
  0xf7   : > { %v781_v47 = vmax.f32 %v779_v46, 0.0  ;;  %2973 = vmatprep.subr.mxu1 %v782_v45  ;;  %v1147_v46 = vld [vmem:[%s4845_s5 + $0x20] sm:$0xff] }
  0xf8   : > { %2974 = vmatpush3.msra.mxu1 %v782_v45 }
  0xf9   : > { %2975 = vmatprep.subr.mxu1 %v781_v47 }
  0xfa   : > { %2976 = vmatpush3.msra.mxu1 %v781_v47 }
  0xfb   : > { %2978 = vmatmul.mubr.msk.f32.vlgmr.msra.gmra.mxu1 %vm785_vm2, %v784_v48  ;;  %2980 = vmatprep.subr.mxu1 %v782_v45  ;;  %v1146_v48 = vld [vmem:[%s4845_s5 + $0x18] sm:$0xff] }
  0xfc   : > { %2981 = vmatpush3.msra.mxu1 %v782_v45  ;;  %2984 = vmatprep.mubr.msk.f32.mxu1 %vm785_vm2, %v2634_v49  ;;  %v2657_v45 = vld [vmem:[%s4845_s5 + $0xb8] sm:$0xff]  ;;  %v2655_v49 = vld [vmem:[%s4845_s5 + $0xa8] sm:$0xff] }
  0xfd   : > { %2982 = vmatprep.subr.mxu1 %v781_v47 }
  0xfe   : > { %2983 = vmatpush3.msra.mxu1 %v781_v47  ;;  %v2656_v47 = vld [vmem:[%s4845_s5 + $0xb0] sm:$0xff] }
  0xff   : > { %2985 = vmatmul.mubr.msk.f32.vlgmr.msra.gmra.mxu1 %vm785_vm2, %v2635_v50  ;;  %2987 = vmatprep.subr.mxu1 %v968_v51  ;;  %v1145_v50 = vld [vmem:[%s4845_s5 + $0x10] sm:$0xff] }
 0x100   : > { %2988 = vmatpush3.msra.mxu1 %v968_v51  ;;  %v2654_v51 = vld [vmem:[%s4845_s5 + $0xa0] sm:$0xff] }
 0x101   : > { %2989 = vmatprep.subr.mxu1 %v967_v52 }
 0x102   : > { %2990 = vmatpush3.msra.mxu1 %v967_v52  ;;  %v1144_v52 = vld [vmem:[%s4845_s5 + $0x8] sm:$0xff] }
 0x103   : > { %2991 = vmatprep.subr.mxu1 %v966_v53 }
 0x104   : > { %2992 = vmatpush3.msra.mxu1 %v966_v53  ;;  %v1143_v53 = vld [vmem:[%s4845_s5] sm:$0xff] }
 0x105   : > { %2993 = vmatprep.subr.mxu1 %v965_v54 }
 0x106   : > { %2994 = vmatpush3.msra.mxu1 %v965_v54  ;;  %v2695_v54 = vld [vmem:[%s4845_s5 + $0x1d8] sm:$0xff] }
 0x107   : > { %2995 = vmatprep.subr.mxu1 %v964_v55 }
 0x108   : > { %2996 = vmatpush3.msra.mxu1 %v964_v55  ;;  %v3160_v55 = vmov 0.0  }
 0x109   : > { %2997 = vmatprep.subr.mxu1 %v963_v56 }
 0x10a   : > { %2998 = vmatpush3.msra.mxu1 %v963_v56 }
 0x10b   : > { %2999 = vmatprep.subr.mxu1 %v962_v57 }
 0x10c   : > { %3000 = vmatpush3.msra.mxu1 %v962_v57 }
 0x10d   : > { %3001 = vmatprep.subr.mxu1 %v961_v58 }
 0x10e   : > { %3002 = vmatpush3.msra.mxu1 %v961_v58 }
 0x10f   : > { %3003 = vmatprep.subr.mxu1 %v960_v59 }
 0x110   : > { %3004 = vmatpush3.msra.mxu1 %v960_v59 }
 0x111   : > { %3005 = vmatprep.subr.mxu1 %v959_v60 }
 0x112   : > { %3006 = vmatpush3.msra.mxu1 %v959_v60 }
 0x113   : > { %3007 = vmatprep.subr.mxu1 %v958_v61 }
 0x114   : > { %3008 = vmatpush3.msra.mxu1 %v958_v61 }
 0x115   : > { %3009 = vmatprep.subr.mxu1 %v957_v62 }
 0x116   : > { %3010 = vmatpush3.msra.mxu1 %v957_v62  ;;  %v2694_v62 = vld [vmem:[%s4845_s5 + $0x1d0] sm:$0xff] }
 0x117   : > { %3011 = vmatprep.subr.mxu1 %v956_v0 }
 0x118   : > { %3012 = vmatpush3.msra.mxu1 %v956_v0 }
 0x119   : > { %3013 = vmatprep.subr.mxu1 %v955_v2 }
 0x11a   : > { %3014 = vmatpush3.msra.mxu1 %v955_v2  ;;  %v2692_v2 = vld [vmem:[%s4845_s5 + $0x1c0] sm:$0xff] }
 0x11b   : > { %3015 = vmatprep.subr.mxu1 %v954_v4 }
 0x11c   : > { %3016 = vmatpush3.msra.mxu1 %v954_v4  ;;  %v2690_v4 = vld [vmem:[%s4845_s5 + $0x1b0] sm:$0xff] }
 0x11d   : > { %3017 = vmatprep.subr.mxu1 %v953_v6 }
 0x11e   : > { %3018 = vmatpush3.msra.mxu1 %v953_v6  ;;  %v2688_v6 = vld [vmem:[%s4845_s5 + $0x1a0] sm:$0xff] }
 0x11f   : > { %1200 = vmatprep.subr.mxu1 %v2673_v8  ;;  %v2686_v8 = vld [vmem:[%s4845_s5 + $0x190] sm:$0xff] }
 0x1bb   : > { %v2979_v10 = vpop.f32.mrf.mxu1 }
 0x1bd   : > { %v858_v11 = vpop.f32.mrf.mxu1 }
 0x1bf   : > { %v2986_v12 = vpop.f32.mrf.mxu1 }
 0x1c0   : > { %v952_v15 = vmax.f32 %v2979_v10, %v2986_v12  ;;  %v2684_v10 = vld [vmem:[%s4845_s5 + $0x180] sm:$0xff]  ;;  %v2682_v12 = vld [vmem:[%s4845_s5 + $0x170] sm:$0xff] }
 0x1c1   : > { %v942_v13 = vpop.f32.mrf.mxu1 }
 0x1c2   : > { %v951_v14 = vmax.f32 %v858_v11, %v942_v13  ;;  %v2683_v11 = vld [vmem:[%s4845_s5 + $0x178] sm:$0xff]  ;;  %v2681_v13 = vld [vmem:[%s4845_s5 + $0x168] sm:$0xff] }
 0x1c4   : > { %3019 = vmatprep.mubr.f32.mxu1 %v951_v14  ;;  %3054 = vmatprep.mubr.f32.mxu0 %v951_v14  ;;  %v2680_v14 = vld [vmem:[%s4845_s5 + $0x160] sm:$0xff] }
 0x1c5   : > { %3020 = vmatmul.mubr.f32.vlgmr.msra.gmra.mxu1 %v952_v15  ;;  %3055 = vmatmul.mubr.f32.vlgmr.msra.gmra.mxu0 %v952_v15  ;;  %v2679_v15 = vld [vmem:[%s4845_s5 + $0x158] sm:$0xff] }
 0x1c6   : > { %1201 = vmatpush1.msra.mxu1 %v2672_v16  ;;  %1275 = vmatpush1.msra.mxu0 %v1161_v17  ;;  %v2678_v16 = vld [vmem:[%s4845_s5 + $0x150] sm:$0xff]  ;;  %v2677_v17 = vld [vmem:[%s4845_s5 + $0x148] sm:$0xff] }
 0x1c7   : > { %1202 = vmatprep.subr.mxu1 %v2671_v18  ;;  %1276 = vmatprep.subr.mxu0 %v1160_v19  ;;  %v2676_v18 = vld [vmem:[%s4845_s5 + $0x140] sm:$0xff] }
 0x1c8   : > { %1203 = vmatpush1.msra.mxu1 %v2670_v20  ;;  %1277 = vmatpush1.msra.mxu0 %v1159_v21  ;;  %v2731_v20 = vld [vmem:[%s4848_s8 + $0x2f8] sm:$0xff]  ;;  %v2730_v21 = vld [vmem:[%s4848_s8 + $0x2f0] sm:$0xff] }
 0x1c9   : > { %1204 = vmatprep.subr.mxu1 %v2669_v22  ;;  %1278 = vmatprep.subr.mxu0 %v1158_v23  ;;  %v2729_v22 = vld [vmem:[%s4848_s8 + $0x2e8] sm:$0xff]  ;;  %v2728_v23 = vld [vmem:[%s4848_s8 + $0x2e0] sm:$0xff] }
 0x1ca   : > { %1205 = vmatpush1.msra.mxu1 %v2668_v24  ;;  %1279 = vmatpush1.msra.mxu0 %v1157_v25  ;;  %v2727_v24 = vld [vmem:[%s4848_s8 + $0x2d8] sm:$0xff]  ;;  %v2726_v25 = vld [vmem:[%s4848_s8 + $0x2d0] sm:$0xff] }
 0x1cb   : > { %1206 = vmatprep.subr.mxu1 %v2667_v26  ;;  %1280 = vmatprep.subr.mxu0 %v1156_v27  ;;  %v2725_v26 = vld [vmem:[%s4848_s8 + $0x2c8] sm:$0xff]  ;;  %v2724_v27 = vld [vmem:[%s4848_s8 + $0x2c0] sm:$0xff] }
 0x1cc   : > { %1207 = vmatpush1.msra.mxu1 %v2666_v28  ;;  %1281 = vmatpush1.msra.mxu0 %v1155_v30  ;;  %v2723_v28 = vld [vmem:[%s4848_s8 + $0x2b8] sm:$0xff]  ;;  %v2721_v30 = vld [vmem:[%s4848_s8 + $0x2a8] sm:$0xff] }
 0x1cd   : > { %1208 = vmatprep.subr.mxu1 %v2665_v29  ;;  %1282 = vmatprep.subr.mxu0 %v1154_v32  ;;  %v2722_v29 = vld [vmem:[%s4848_s8 + $0x2b0] sm:$0xff]  ;;  %v2719_v32 = vld [vmem:[%s4848_s8 + $0x298] sm:$0xff] }
 0x1ce   : > { %1209 = vmatpush1.msra.mxu1 %v2664_v31  ;;  %1283 = vmatpush1.msra.mxu0 %v1153_v34  ;;  %v2720_v31 = vld [vmem:[%s4848_s8 + $0x2a0] sm:$0xff]  ;;  %v2717_v34 = vld [vmem:[%s4848_s8 + $0x288] sm:$0xff] }
 0x1cf   : > { %1210 = vmatprep.subr.mxu1 %v2663_v33  ;;  %1284 = vmatprep.subr.mxu0 %v1152_v36  ;;  %v2718_v33 = vld [vmem:[%s4848_s8 + $0x290] sm:$0xff]  ;;  %v2715_v36 = vld [vmem:[%s4848_s8 + $0x278] sm:$0xff] }
 0x1d0   : > { %1211 = vmatpush1.msra.mxu1 %v2662_v35  ;;  %1285 = vmatpush1.msra.mxu0 %v1151_v38  ;;  %v2716_v35 = vld [vmem:[%s4848_s8 + $0x280] sm:$0xff]  ;;  %v2713_v38 = vld [vmem:[%s4848_s8 + $0x268] sm:$0xff] }
 0x1d1   : > { %1212 = vmatprep.subr.mxu1 %v2661_v37  ;;  %1286 = vmatprep.subr.mxu0 %v1150_v40  ;;  %v2714_v37 = vld [vmem:[%s4848_s8 + $0x270] sm:$0xff]  ;;  %v2711_v40 = vld [vmem:[%s4848_s8 + $0x258] sm:$0xff] }
 0x1d2   : > { %1213 = vmatpush1.msra.mxu1 %v2660_v39  ;;  %1287 = vmatpush1.msra.mxu0 %v1149_v42  ;;  %v2712_v39 = vld [vmem:[%s4848_s8 + $0x260] sm:$0xff]  ;;  %v2709_v42 = vld [vmem:[%s4848_s8 + $0x248] sm:$0xff] }
 0x1d3   : > { %1214 = vmatprep.subr.mxu1 %v2659_v41  ;;  %1288 = vmatprep.subr.mxu0 %v1148_v44  ;;  %v2710_v41 = vld [vmem:[%s4848_s8 + $0x250] sm:$0xff]  ;;  %v2707_v44 = vld [vmem:[%s4848_s8 + $0x238] sm:$0xff] }
 0x1d4   : > { %1215 = vmatpush1.msra.mxu1 %v2658_v43  ;;  %1289 = vmatpush1.msra.mxu0 %v1147_v46  ;;  %v2708_v43 = vld [vmem:[%s4848_s8 + $0x240] sm:$0xff]  ;;  %v2705_v46 = vld [vmem:[%s4848_s8 + $0x228] sm:$0xff] }
 0x1d5   : > { %1216 = vmatprep.subr.mxu1 %v2657_v45  ;;  %1290 = vmatprep.subr.mxu0 %v1146_v48  ;;  %v2706_v45 = vld [vmem:[%s4848_s8 + $0x230] sm:$0xff]  ;;  %v2703_v48 = vld [vmem:[%s4848_s8 + $0x218] sm:$0xff] }
 0x1d6   : > { %1217 = vmatpush1.msra.mxu1 %v2656_v47  ;;  %1291 = vmatpush1.msra.mxu0 %v1145_v50  ;;  %v2704_v47 = vld [vmem:[%s4848_s8 + $0x220] sm:$0xff]  ;;  %v2701_v50 = vld [vmem:[%s4848_s8 + $0x208] sm:$0xff] }
 0x1d7   : > { %1218 = vmatprep.subr.mxu1 %v2655_v49  ;;  %1292 = vmatprep.subr.mxu0 %v1144_v52  ;;  %v2702_v49 = vld [vmem:[%s4848_s8 + $0x210] sm:$0xff]  ;;  %v2763_v52 = vld [vmem:[%s4848_s8 + $0x3f8] sm:$0xff] }
 0x1d8   : > { %1219 = vmatpush1.msra.mxu1 %v2654_v51  ;;  %1252 = vmatprep.mubr.f32.mxu1 %v3160_v55  ;;  %v2700_v51 = vld [vmem:[%s4848_s8 + $0x200] sm:$0xff] }
 0x1d9   : > { %1293 = vmatpush1.msra.mxu0 %v1143_v53  ;;  %1326 = vmatprep.mubr.f32.mxu0 %v3160_v55  ;;  %v2762_v53 = vld [vmem:[%s4848_s8 + $0x3f0] sm:$0xff] }
 0x1da   : > { %1370 = vmatprep.subr.mxu1 %v2695_v54  ;;  %v2761_v54 = vld [vmem:[%s4848_s8 + $0x3e8] sm:$0xff] }
 0x285   : > { %v3021_v56 = vpop.f32.mrf.mxu1  ;;  %v3056_v57 = vpop.f32.mrf.mxu0 }
 0x286   : > { %v1137_v58 = vmax.f32 %v3021_v56, %v3056_v57  ;;  %v2760_v56 = vld [vmem:[%s4848_s8 + $0x3e0] sm:$0xff]  ;;  %v2759_v57 = vld [vmem:[%s4848_s8 + $0x3d8] sm:$0xff] }
 0x287   : > { %v1035_v59 = vpop.f32.mrf.mxu1  ;;  %v1127_v60 = vpop.f32.mrf.mxu0 }
 0x288   : > { %1141 = vst.msk [vmem:[#allocation2 + $0x8] sm:$0x3] %vm1140_vm3, %v1137_v58  ;;  %v1136_v61 = vmax.f32 %v1035_v59, %v1127_v60  ;;  %v2758_v58 = vld [vmem:[%s4848_s8 + $0x3d0] sm:$0xff]  ;;  %v2757_v59 = vld [vmem:[%s4848_s8 + $0x3c8] sm:$0xff]  ;;  %v2756_v60 = vld [vmem:[%s4848_s8 + $0x3c0] sm:$0xff] }
 0x28a   : > { %1139 = vst.msk [vmem:[#allocation2] sm:$0xff] %vm1138_vm4, %v1136_v61  ;;  %v2755_v61 = vld [vmem:[%s4848_s8 + $0x3b8] sm:$0xff] }
 0x291   : > { %v1163_v63 = vld [vmem:[#allocation2 + $0x1] sm:$0xff] }
 0x292   : > { %v1142_v0 = vld [vmem:[#allocation2] sm:$0xff]  ;;  %2674 = vmatmul.mubr.msk.f32.vlgmr.msra.gmra.mxu1 %vm1138_vm4, %v1163_v63  ;;  %v2753_v63 = vld [vmem:[%s4848_s8 + $0x3a8] sm:$0xff] }
 0x293   : > { %2675 = vmatmul.mubr.msk.f32.vlgmr.msra.gmra.mxu0 %vm1138_vm4, %v1142_v0  ;;  %1371 = vmatpush1.msra.mxu1 %v2694_v62  ;;  %v1333_v19 = vld [vmem:[#allocation2 + $0x2] sm:$0xff]  ;;  %v2754_v62 = vld [vmem:[%s4848_s8 + $0x3b0] sm:$0xff] }
 0x294   : > { %1422 = vmatprep.mubr.f32.mxu1 %v3160_v55  ;;  %1372 = vmatprep.subr.mxu1 %v2693_v1  ;;  %v2752_v0 = vld [vmem:[%s4848_s8 + $0x3a0] sm:$0xff]  ;;  %v2751_v1 = vld [vmem:[%s4848_s8 + $0x398] sm:$0xff] }
 0x295   : > { %1516 = vmatprep.mubr.f32.mxu0 %v3160_v55  ;;  %1373 = vmatpush1.msra.mxu1 %v2692_v2  ;;  %v2750_v2 = vld [vmem:[%s4848_s8 + $0x390] sm:$0xff] }
 0x296   : > { %1374 = vmatprep.subr.mxu1 %v2691_v3  ;;  %v2749_v3 = vld [vmem:[%s4848_s8 + $0x388] sm:$0xff] }
 0x297   : > { %1375 = vmatpush1.msra.mxu1 %v2690_v4  ;;  %v2748_v4 = vld [vmem:[%s4848_s8 + $0x380] sm:$0xff] }
 0x298   : > { %1376 = vmatprep.subr.mxu1 %v2689_v5  ;;  %v2747_v5 = vld [vmem:[%s4848_s8 + $0x378] sm:$0xff] }
 0x299   : > { %1377 = vmatpush1.msra.mxu1 %v2688_v6  ;;  %v2746_v6 = vld [vmem:[%s4848_s8 + $0x370] sm:$0xff] }
 0x29a   : > { %1378 = vmatprep.subr.mxu1 %v2687_v7  ;;  %v2745_v7 = vld [vmem:[%s4848_s8 + $0x368] sm:$0xff] }
 0x29b   : > { %1379 = vmatpush1.msra.mxu1 %v2686_v8  ;;  %v2744_v8 = vld [vmem:[%s4848_s8 + $0x360] sm:$0xff] }
 0x29c   : > { %1380 = vmatprep.subr.mxu1 %v2685_v9  ;;  %v2743_v9 = vld [vmem:[%s4848_s8 + $0x358] sm:$0xff] }
 0x29d   : > { %1381 = vmatpush1.msra.mxu1 %v2684_v10  ;;  %v2742_v10 = vld [vmem:[%s4848_s8 + $0x350] sm:$0xff] }
 0x29e   : > { %1382 = vmatprep.subr.mxu1 %v2683_v11  ;;  %v1433_v11 = vlaneseq }
 0x29f   : > { %1383 = vmatpush1.msra.mxu1 %v2682_v12 }
 0x2a0   : > { %1384 = vmatprep.subr.mxu1 %v2681_v13  ;;  %v1434_v12 = vshrl.u32 %v1433_v11, 7  ;;  %v1656_v11 = vld [vmem:[%s4848_s8 + $0x1b8] sm:$0xff] }
 0x2a1   : > { %1385 = vmatpush1.msra.mxu1 %v2680_v14 }
 0x2a2   : > { %1386 = vmatprep.subr.mxu1 %v2679_v15  ;;  %v3825_v15 = vsub.s32 0, %v1434_v12 }
 0x2a3   : > { %1387 = vmatpush1.msra.mxu1 %v2678_v16  ;;  %v1431_v16 = vld [vmem:[%s4846_s6] sm:$0x3] }
 0x2a4   : > { %1388 = vmatprep.subr.mxu1 %v2677_v17  ;;  %v3830_v17 = vsub.s32 1, %v1434_v12  ;;  %v1655_v12 = vld [vmem:[%s4848_s8 + $0x1b0] sm:$0xff] }
 0x2a5   : > { %1389 = vmatpush1.msra.mxu1 %v2676_v18 }
 0x2a6   : > { %2696 = vmatmul.mubr.msk.f32.vlgmr.msra.gmra.mxu1 %vm1138_vm4, %v1333_v19  ;;  %1801 = vmatprep.subr.mxu1 %v2731_v20 }
 0x2a7   : > { %1802 = vmatpush1.msra.mxu1 %v2730_v21 }
 0x2a8   : > { %1803 = vmatprep.subr.mxu1 %v2729_v22  ;;  %v1436_v22 = vrot.slane %v1431_v16, %v3825_v15 }
 0x2a9   : > { %1804 = vmatpush1.msra.mxu1 %v2728_v23 }
 0x2aa   : > { %1805 = vmatprep.subr.mxu1 %v2727_v24 }
 0x2ab   : > { %1806 = vmatpush1.msra.mxu1 %v2726_v25  ;;  %v1440_v25 = vrot.slane %v1431_v16, %v3830_v17  ;;  %v1652_v16 = vld [vmem:[%s4848_s8 + $0x198] sm:$0xff] }
 0x2ac   : > { %1807 = vmatprep.subr.mxu1 %v2725_v26 }
 0x2ad   : > { %1808 = vmatpush1.msra.mxu1 %v2724_v27 }
 0x2ae   : > { %1809 = vmatprep.subr.mxu1 %v2723_v28 }
 0x2af   : > { %1810 = vmatpush1.msra.mxu1 %v2722_v29 }
 0x2b0   : > { %1811 = vmatprep.subr.mxu1 %v2721_v30 }
 0x2b1   : > { %1812 = vmatpush1.msra.mxu1 %v2720_v31 }
 0x2b2   : > { %1813 = vmatprep.subr.mxu1 %v2719_v32  ;;  %v1447_v32 = vld [vmem:[%s4847_s7] sm:$0x3f] }
 0x2b3   : > { %1814 = vmatpush1.msra.mxu1 %v2718_v33  ;;  %v1632_v33 = vld [vmem:[%s4848_s8 + $0xf8] sm:$0xff] }
 0x2b4   : > { %1815 = vmatprep.subr.mxu1 %v2717_v34  ;;  %v2698_v34 = vld [vmem:[%s4847_s7 + $0x8] sm:$0x3f] }
 0x2b5   : > { %1816 = vmatpush1.msra.mxu1 %v2716_v35  ;;  %v1631_v35 = vld [vmem:[%s4848_s8 + $0xf0] sm:$0xff] }
 0x2b6   : > { %1817 = vmatprep.subr.mxu1 %v2715_v36  ;;  %v1630_v36 = vld [vmem:[%s4848_s8 + $0xe8] sm:$0xff] }
 0x2b7   : > { %1818 = vmatpush1.msra.mxu1 %v2714_v37  ;;  %v1629_v37 = vld [vmem:[%s4848_s8 + $0xe0] sm:$0xff] }
 0x2b8   : > { %1819 = vmatprep.subr.mxu1 %v2713_v38  ;;  %v1628_v38 = vld [vmem:[%s4848_s8 + $0xd8] sm:$0xff] }
 0x2b9   : > { %1820 = vmatpush1.msra.mxu1 %v2712_v39  ;;  %v1627_v39 = vld [vmem:[%s4848_s8 + $0xd0] sm:$0xff] }
 0x2ba   : > { %1821 = vmatprep.subr.mxu1 %v2711_v40  ;;  %v1626_v40 = vld [vmem:[%s4848_s8 + $0xc8] sm:$0xff] }
 0x2bb   : > { %1822 = vmatpush1.msra.mxu1 %v2710_v41  ;;  %v1625_v41 = vld [vmem:[%s4848_s8 + $0xc0] sm:$0xff] }
 0x2bc   : > { %1823 = vmatprep.subr.mxu1 %v2709_v42  ;;  %v1624_v42 = vld [vmem:[%s4848_s8 + $0xb8] sm:$0xff] }
 0x2bd   : > { %1824 = vmatpush1.msra.mxu1 %v2708_v43  ;;  %v1623_v43 = vld [vmem:[%s4848_s8 + $0xb0] sm:$0xff] }
 0x2be   : > { %1825 = vmatprep.subr.mxu1 %v2707_v44  ;;  %v1622_v44 = vld [vmem:[%s4848_s8 + $0xa8] sm:$0xff] }
 0x2bf   : > { %1826 = vmatpush1.msra.mxu1 %v2706_v45  ;;  %v1621_v45 = vld [vmem:[%s4848_s8 + $0xa0] sm:$0xff] }
 0x2c0   : > { %1827 = vmatprep.subr.mxu1 %v2705_v46  ;;  %v1620_v46 = vld [vmem:[%s4848_s8 + $0x98] sm:$0xff] }
 0x2c1   : > { %1828 = vmatpush1.msra.mxu1 %v2704_v47  ;;  %v1619_v47 = vld [vmem:[%s4848_s8 + $0x90] sm:$0xff] }
 0x2c2   : > { %1829 = vmatprep.subr.mxu1 %v2703_v48  ;;  %v1618_v48 = vld [vmem:[%s4848_s8 + $0x88] sm:$0xff] }
 0x2c3   : > { %1830 = vmatpush1.msra.mxu1 %v2702_v49  ;;  %v1617_v49 = vld [vmem:[%s4848_s8 + $0x80] sm:$0xff] }
 0x2c4   : > { %1831 = vmatprep.subr.mxu1 %v2701_v50  ;;  %v1616_v50 = vld [vmem:[%s4848_s8 + $0x78] sm:$0xff] }
 0x2c5   : > { %1832 = vmatpush1.msra.mxu1 %v2700_v51  ;;  %v1615_v51 = vld [vmem:[%s4848_s8 + $0x70] sm:$0xff] }
 0x2c6   : > { %1833 = vmatprep.subr.mxu1 %v2763_v52  ;;  %v1614_v52 = vld [vmem:[%s4848_s8 + $0x68] sm:$0xff] }
 0x2c7   : > { %1834 = vmatpush2.msra.mxu1 %v2762_v53  ;;  %v1613_v53 = vld [vmem:[%s4848_s8 + $0x60] sm:$0xff] }
 0x2c8   : > { %1835 = vmatprep.subr.mxu1 %v2761_v54  ;;  %v1612_v54 = vld [vmem:[%s4848_s8 + $0x58] sm:$0xff] }
 0x2c9   : > { %1836 = vmatpush2.msra.mxu1 %v2760_v56  ;;  %v1611_v56 = vld [vmem:[%s4848_s8 + $0x50] sm:$0xff] }
 0x2ca   : > { %1837 = vmatprep.subr.mxu1 %v2759_v57  ;;  %v1610_v57 = vld [vmem:[%s4848_s8 + $0x48] sm:$0xff] }
 0x2cb   : > { %1838 = vmatpush2.msra.mxu1 %v2758_v58  ;;  %v1609_v58 = vld [vmem:[%s4848_s8 + $0x40] sm:$0xff] }
 0x2cc   : > { %1839 = vmatprep.subr.mxu1 %v2757_v59  ;;  %v1608_v59 = vld [vmem:[%s4848_s8 + $0x38] sm:$0xff] }
 0x2cd   : > { %1840 = vmatpush2.msra.mxu1 %v2756_v60  ;;  %v1607_v60 = vld [vmem:[%s4848_s8 + $0x30] sm:$0xff] }
 0x2ce   : > { %1841 = vmatprep.subr.mxu1 %v2755_v61  ;;  %v1606_v61 = vld [vmem:[%s4848_s8 + $0x28] sm:$0xff] }
 0x2cf   : > { %1842 = vmatpush2.msra.mxu1 %v2754_v62  ;;  %v1605_v62 = vld [vmem:[%s4848_s8 + $0x20] sm:$0xff] }
 0x2d0   : > { %1843 = vmatprep.subr.mxu1 %v2753_v63  ;;  %v1604_v63 = vld [vmem:[%s4848_s8 + $0x18] sm:$0xff] }
 0x2d1   : > { %1844 = vmatpush2.msra.mxu1 %v2752_v0  ;;  %v1603_v0 = vld [vmem:[%s4848_s8 + $0x10] sm:$0xff] }
 0x2d2   : > { %1845 = vmatprep.subr.mxu1 %v2751_v1  ;;  %v1602_v1 = vld [vmem:[%s4848_s8 + $0x8] sm:$0xff] }
 0x2d3   : > { %1846 = vmatpush2.msra.mxu1 %v2750_v2  ;;  %v1601_v2 = vld [vmem:[%s4848_s8] sm:$0xff] }
 0x2d4   : > { %1847 = vmatprep.subr.mxu1 %v2749_v3  ;;  %v1664_v3 = vld [vmem:[%s4848_s8 + $0x1f8] sm:$0xff] }
 0x2d5   : > { %1848 = vmatpush2.msra.mxu1 %v2748_v4  ;;  %v1663_v4 = vld [vmem:[%s4848_s8 + $0x1f0] sm:$0xff] }
 0x2d6   : > { %1849 = vmatprep.subr.mxu1 %v2747_v5  ;;  %v1662_v5 = vld [vmem:[%s4848_s8 + $0x1e8] sm:$0xff] }
 0x2d7   : > { %1850 = vmatpush2.msra.mxu1 %v2746_v6  ;;  %v1661_v6 = vld [vmem:[%s4848_s8 + $0x1e0] sm:$0xff] }
 0x2d8   : > { %1851 = vmatprep.subr.mxu1 %v2745_v7  ;;  %v1660_v7 = vld [vmem:[%s4848_s8 + $0x1d8] sm:$0xff] }
 0x2d9   : > { %1852 = vmatpush2.msra.mxu1 %v2744_v8  ;;  %v1659_v8 = vld [vmem:[%s4848_s8 + $0x1d0] sm:$0xff] }
 0x2da   : > { %1853 = vmatprep.subr.mxu1 %v2743_v9  ;;  %v1658_v9 = vld [vmem:[%s4848_s8 + $0x1c8] sm:$0xff] }
 0x2db   : > { %1854 = vmatpush2.msra.mxu1 %v2742_v10  ;;  %v1657_v10 = vld [vmem:[%s4848_s8 + $0x1c0] sm:$0xff] }
 0x352   : > { %v1254_v13 = vpop.f32.mrf.mxu1 }
 0x353   : > { %v1328_v14 = vpop.f32.mrf.mxu0 }
 0x354   : > { %v1256_v18 = vpop.f32.mrf.mxu1  ;;  %v1329_v20 = vadd.f32 %v1328_v14, %v1254_v13  ;;  %v1654_v13 = vld [vmem:[%s4848_s8 + $0x1a8] sm:$0xff]  ;;  %v1653_v14 = vld [vmem:[%s4848_s8 + $0x1a0] sm:$0xff] }
 0x355   : > { %v1330_v19 = vpop.f32.mrf.mxu0 }
 0x356   : > { %v1331_v23 = vadd.f32 %v1330_v19, %v1256_v18  ;;  %v1651_v18 = vld [vmem:[%s4848_s8 + $0x190] sm:$0xff]  ;;  %v1650_v19 = vld [vmem:[%s4848_s8 + $0x188] sm:$0xff] }
 0x366   : > { %v1424_v21 = vpop.f32.mrf.mxu1 }
 0x367   : > { %v1429_v24 = vadd.f32 %v1424_v21, %v1329_v20  ;;  %v1649_v20 = vld [vmem:[%s4848_s8 + $0x180] sm:$0xff]  ;;  %v1648_v21 = vld [vmem:[%s4848_s8 + $0x178] sm:$0xff] }
 0x368   : > { %v1426_v26 = vpop.f32.mrf.mxu1 }
 0x369   : > { %v1430_v27 = vadd.f32 %v1426_v26, %v1331_v23  ;;  %v1443_v28 = vadd.f32 %v1436_v22, %v1429_v24  ;;  %v1647_v22 = vld [vmem:[%s4848_s8 + $0x170] sm:$0xff]  ;;  %v1646_v23 = vld [vmem:[%s4848_s8 + $0x168] sm:$0xff]  ;;  %v1645_v24 = vld [vmem:[%s4848_s8 + $0x160] sm:$0xff] }
 0x36a   : > { %v1643_v26 = vld [vmem:[%s4848_s8 + $0x150] sm:$0xff] }
 0x36b   : > { %v1444_v29 = vadd.f32 %v1440_v25, %v1430_v27  ;;  %v1445_v31 = vmax.f32 %v1443_v28, 0.0  ;;  %v1644_v25 = vld [vmem:[%s4848_s8 + $0x158] sm:$0xff]  ;;  %v1642_v27 = vld [vmem:[%s4848_s8 + $0x148] sm:$0xff] }
 0x36c   : > { %v2741_v28 = vld [vmem:[%s4848_s8 + $0x348] sm:$0xff] }
 0x36d   : > { %v1446_v30 = vmax.f32 %v1444_v29, 0.0  ;;  %1855 = vmatprep.subr.mxu1 %v2741_v28  ;;  %v1641_v29 = vld [vmem:[%s4848_s8 + $0x140] sm:$0xff]  ;;  %v1892_v28 = vld [vmem:[%s4849_s9 + $0x68] sm:$0xff] }
 0x36f   : > { %1482 = vmatprep.subr.mxu0 %v1446_v30 }
 0x370   : > { %1483 = vmatpush1.msra.mxu0 %v1445_v31 }
 0x371   : > { %2697 = vmatmul.mubr.msk.f32.vlgmr.msra.gmra.mxu0 %vm1448_vm5, %v1447_v32  ;;  %1558 = vmatprep.subr.mxu0 %v1446_v30  ;;  %v2740_v30 = vld [vmem:[%s4848_s8 + $0x340] sm:$0xff]  ;;  %v2739_v32 = vld [vmem:[%s4848_s8 + $0x338] sm:$0xff] }
 0x372   : > { %1559 = vmatpush1.msra.mxu0 %v1445_v31  ;;  %1592 = vmatprep.mubr.f32.mxu0 %v3160_v55  ;;  %v1640_v31 = vld [vmem:[%s4848_s8 + $0x138] sm:$0xff] }
 0x373   : > { %1665 = vmatprep.subr.mxu0 %v1632_v33  ;;  %1856 = vmatpush2.msra.mxu1 %v2740_v30  ;;  %v1639_v33 = vld [vmem:[%s4848_s8 + $0x130] sm:$0xff]  ;;  %v1891_v30 = vld [vmem:[%s4849_s9 + $0x60] sm:$0xff] }
 0x374   : > { %1857 = vmatprep.subr.mxu1 %v2739_v32  ;;  %v1890_v32 = vld [vmem:[%s4849_s9 + $0x58] sm:$0xff] }
 0x375   : > { %2699 = vmatmul.mubr.msk.f32.vlgmr.msra.gmra.mxu0 %vm1448_vm5, %v2698_v34  ;;  %v2738_v34 = vld [vmem:[%s4848_s8 + $0x330] sm:$0xff] }
 0x376   : > { %1666 = vmatpush1.msra.mxu0 %v1631_v35  ;;  %1858 = vmatpush2.msra.mxu1 %v2738_v34  ;;  %v1638_v35 = vld [vmem:[%s4848_s8 + $0x128] sm:$0xff]  ;;  %v1889_v34 = vld [vmem:[%s4849_s9 + $0x50] sm:$0xff] }
 0x377   : > { %1667 = vmatprep.subr.mxu0 %v1630_v36  ;;  %v2737_v36 = vld [vmem:[%s4848_s8 + $0x328] sm:$0xff] }
 0x378   : > { %1668 = vmatpush1.msra.mxu0 %v1629_v37  ;;  %1859 = vmatprep.subr.mxu1 %v2737_v36  ;;  %v1637_v37 = vld [vmem:[%s4848_s8 + $0x120] sm:$0xff]  ;;  %v1888_v36 = vld [vmem:[%s4849_s9 + $0x48] sm:$0xff] }
 0x379   : > { %1669 = vmatprep.subr.mxu0 %v1628_v38  ;;  %v2736_v38 = vld [vmem:[%s4848_s8 + $0x320] sm:$0xff] }
 0x37a   : > { %1670 = vmatpush1.msra.mxu0 %v1627_v39  ;;  %1860 = vmatpush2.msra.mxu1 %v2736_v38  ;;  %v1636_v39 = vld [vmem:[%s4848_s8 + $0x118] sm:$0xff]  ;;  %v1887_v38 = vld [vmem:[%s4849_s9 + $0x40] sm:$0xff] }
 0x37b   : > { %1671 = vmatprep.subr.mxu0 %v1626_v40  ;;  %v2735_v40 = vld [vmem:[%s4848_s8 + $0x318] sm:$0xff] }
 0x37c   : > { %1672 = vmatpush1.msra.mxu0 %v1625_v41  ;;  %1861 = vmatprep.subr.mxu1 %v2735_v40  ;;  %v1635_v41 = vld [vmem:[%s4848_s8 + $0x110] sm:$0xff]  ;;  %v1886_v40 = vld [vmem:[%s4849_s9 + $0x38] sm:$0xff] }
 0x37d   : > { %1673 = vmatprep.subr.mxu0 %v1624_v42  ;;  %v2734_v42 = vld [vmem:[%s4848_s8 + $0x310] sm:$0xff] }
 0x37e   : > { %1674 = vmatpush1.msra.mxu0 %v1623_v43  ;;  %1862 = vmatpush2.msra.mxu1 %v2734_v42  ;;  %v1634_v43 = vld [vmem:[%s4848_s8 + $0x108] sm:$0xff]  ;;  %v1885_v42 = vld [vmem:[%s4849_s9 + $0x30] sm:$0xff] }
 0x37f   : > { %1675 = vmatprep.subr.mxu0 %v1622_v44  ;;  %v2733_v44 = vld [vmem:[%s4848_s8 + $0x308] sm:$0xff] }
 0x380   : > { %1676 = vmatpush1.msra.mxu0 %v1621_v45  ;;  %v1633_v45 = vld [vmem:[%s4848_s8 + $0x100] sm:$0xff]  ;;  %1863 = vmatprep.subr.mxu1 %v2733_v44  ;;  %v1884_v44 = vld [vmem:[%s4849_s9 + $0x28] sm:$0xff] }
 0x381   : > { %1677 = vmatprep.subr.mxu0 %v1620_v46  ;;  %v2732_v46 = vld [vmem:[%s4848_s8 + $0x300] sm:$0xff] }
 0x382   : > { %1678 = vmatpush1.msra.mxu0 %v1619_v47  ;;  %1864 = vmatpush2.msra.mxu1 %v2732_v46  ;;  %v1910_v47 = vld [vmem:[%s4849_s9 + $0xf8] sm:$0xff]  ;;  %v1883_v46 = vld [vmem:[%s4849_s9 + $0x20] sm:$0xff] }
 0x383   : > { %1679 = vmatprep.subr.mxu0 %v1618_v48  ;;  %v2795_v48 = vld [vmem:[%s4849_s9 + $0x278] sm:$0xff]  ;;  %2060 = vmatprep.subr.mxu1 %v1910_v47  ;;  %v2768_v47 = vld [vmem:[%s4849_s9 + $0x1a0] sm:$0xff] }
 0x384   : > { %1680 = vmatpush1.msra.mxu0 %v1617_v49 }
 0x385   : > { %1681 = vmatprep.subr.mxu0 %v1616_v50 }
 0x386   : > { %1682 = vmatpush1.msra.mxu0 %v1615_v51 }
 0x387   : > { %1683 = vmatprep.subr.mxu0 %v1614_v52 }
 0x388   : > { %1684 = vmatpush1.msra.mxu0 %v1613_v53 }
 0x389   : > { %1685 = vmatprep.subr.mxu0 %v1612_v54 }
 0x38a   : > { %1686 = vmatpush1.msra.mxu0 %v1611_v56  ;;  %v1909_v56 = vld [vmem:[%s4849_s9 + $0xf0] sm:$0xff] }
 0x38b   : > { %1687 = vmatprep.subr.mxu0 %v1610_v57  ;;  %v2794_v57 = vld [vmem:[%s4849_s9 + $0x270] sm:$0xff] }
 0x38c   : > { %1688 = vmatpush1.msra.mxu0 %v1609_v58  ;;  %v1908_v58 = vld [vmem:[%s4849_s9 + $0xe8] sm:$0xff] }
 0x38d   : > { %1689 = vmatprep.subr.mxu0 %v1608_v59  ;;  %v2793_v59 = vld [vmem:[%s4849_s9 + $0x268] sm:$0xff] }
 0x38e   : > { %1690 = vmatpush1.msra.mxu0 %v1607_v60  ;;  %v1907_v60 = vld [vmem:[%s4849_s9 + $0xe0] sm:$0xff] }
 0x38f   : > { %1691 = vmatprep.subr.mxu0 %v1606_v61  ;;  %v2792_v61 = vld [vmem:[%s4849_s9 + $0x260] sm:$0xff] }
 0x390   : > { %1692 = vmatpush1.msra.mxu0 %v1605_v62  ;;  %v1906_v62 = vld [vmem:[%s4849_s9 + $0xd8] sm:$0xff] }
 0x391   : > { %1693 = vmatprep.subr.mxu0 %v1604_v63  ;;  %v2791_v63 = vld [vmem:[%s4849_s9 + $0x258] sm:$0xff] }
 0x392   : > { %1694 = vmatpush1.msra.mxu0 %v1603_v0  ;;  %v1905_v0 = vld [vmem:[%s4849_s9 + $0xd0] sm:$0xff] }
 0x393   : > { %1695 = vmatprep.subr.mxu0 %v1602_v1  ;;  %v2790_v1 = vld [vmem:[%s4849_s9 + $0x250] sm:$0xff] }
 0x394   : > { %1696 = vmatpush1.msra.mxu0 %v1601_v2  ;;  %v1904_v2 = vld [vmem:[%s4849_s9 + $0xc8] sm:$0xff] }
 0x395   : > { %1697 = vmatprep.subr.mxu0 %v1664_v3  ;;  %v2789_v3 = vld [vmem:[%s4849_s9 + $0x248] sm:$0xff] }
 0x396   : > { %1698 = vmatpush2.msra.mxu0 %v1663_v4  ;;  %v1903_v4 = vld [vmem:[%s4849_s9 + $0xc0] sm:$0xff] }
 0x397   : > { %1699 = vmatprep.subr.mxu0 %v1662_v5  ;;  %v2788_v5 = vld [vmem:[%s4849_s9 + $0x240] sm:$0xff] }
 0x398   : > { %1700 = vmatpush2.msra.mxu0 %v1661_v6  ;;  %v1902_v6 = vld [vmem:[%s4849_s9 + $0xb8] sm:$0xff] }
 0x399   : > { %1701 = vmatprep.subr.mxu0 %v1660_v7  ;;  %v2787_v7 = vld [vmem:[%s4849_s9 + $0x238] sm:$0xff] }
 0x39a   : > { %1702 = vmatpush2.msra.mxu0 %v1659_v8  ;;  %v1901_v8 = vld [vmem:[%s4849_s9 + $0xb0] sm:$0xff] }
 0x39b   : > { %1703 = vmatprep.subr.mxu0 %v1658_v9  ;;  %v2786_v9 = vld [vmem:[%s4849_s9 + $0x230] sm:$0xff] }
 0x39c   : > { %1704 = vmatpush2.msra.mxu0 %v1657_v10  ;;  %v1900_v10 = vld [vmem:[%s4849_s9 + $0xa8] sm:$0xff] }
 0x39d   : > { %1705 = vmatprep.subr.mxu0 %v1656_v11  ;;  %v2785_v11 = vld [vmem:[%s4849_s9 + $0x228] sm:$0xff] }
 0x39e   : > { %1706 = vmatpush2.msra.mxu0 %v1655_v12  ;;  %v1899_v12 = vld [vmem:[%s4849_s9 + $0xa0] sm:$0xff] }
 0x39f   : > { %1707 = vmatprep.subr.mxu0 %v1654_v13  ;;  %v2784_v13 = vld [vmem:[%s4849_s9 + $0x220] sm:$0xff] }
 0x3a0   : > { %1708 = vmatpush2.msra.mxu0 %v1653_v14  ;;  %v1898_v14 = vld [vmem:[%s4849_s9 + $0x98] sm:$0xff] }
 0x3a1   : > { %1709 = vmatprep.subr.mxu0 %v1652_v16  ;;  %v2783_v16 = vld [vmem:[%s4849_s9 + $0x218] sm:$0xff] }
 0x3a2   : > { %1710 = vmatpush2.msra.mxu0 %v1651_v18  ;;  %v1897_v18 = vld [vmem:[%s4849_s9 + $0x90] sm:$0xff] }
 0x3a3   : > { %1711 = vmatprep.subr.mxu0 %v1650_v19  ;;  %v2782_v19 = vld [vmem:[%s4849_s9 + $0x210] sm:$0xff] }
 0x3a4   : > { %1712 = vmatpush2.msra.mxu0 %v1649_v20  ;;  %v1896_v20 = vld [vmem:[%s4849_s9 + $0x88] sm:$0xff] }
 0x3a5   : > { %1713 = vmatprep.subr.mxu0 %v1648_v21  ;;  %v2781_v21 = vld [vmem:[%s4849_s9 + $0x208] sm:$0xff] }
 0x3a6   : > { %1714 = vmatpush2.msra.mxu0 %v1647_v22  ;;  %v1895_v22 = vld [vmem:[%s4849_s9 + $0x80] sm:$0xff] }
 0x3a7   : > { %1715 = vmatprep.subr.mxu0 %v1646_v23  ;;  %v2780_v23 = vld [vmem:[%s4849_s9 + $0x200] sm:$0xff] }
 0x3a8   : > { %1716 = vmatpush2.msra.mxu0 %v1645_v24  ;;  %v1894_v24 = vld [vmem:[%s4849_s9 + $0x78] sm:$0xff] }
 0x3a9   : > { %1717 = vmatprep.subr.mxu0 %v1644_v25  ;;  %v2779_v25 = vld [vmem:[%s4849_s9 + $0x1f8] sm:$0xff] }
 0x3aa   : > { %1718 = vmatpush2.msra.mxu0 %v1643_v26  ;;  %v1893_v26 = vld [vmem:[%s4849_s9 + $0x70] sm:$0xff] }
 0x3ab   : > { %1719 = vmatprep.subr.mxu0 %v1642_v27  ;;  %v2778_v27 = vld [vmem:[%s4849_s9 + $0x1f0] sm:$0xff] }
 0x3ac   : > { %1720 = vmatpush2.msra.mxu0 %v1641_v29  ;;  %v2777_v29 = vld [vmem:[%s4849_s9 + $0x1e8] sm:$0xff] }
 0x3ad   : > { %1721 = vmatprep.subr.mxu0 %v1640_v31  ;;  %v2776_v31 = vld [vmem:[%s4849_s9 + $0x1e0] sm:$0xff] }
 0x3ae   : > { %1722 = vmatpush2.msra.mxu0 %v1639_v33  ;;  %v2775_v33 = vld [vmem:[%s4849_s9 + $0x1d8] sm:$0xff] }
 0x3af   : > { %1723 = vmatprep.subr.mxu0 %v1638_v35  ;;  %v2774_v35 = vld [vmem:[%s4849_s9 + $0x1d0] sm:$0xff] }
 0x3b0   : > { %1724 = vmatpush2.msra.mxu0 %v1637_v37  ;;  %v2773_v37 = vld [vmem:[%s4849_s9 + $0x1c8] sm:$0xff] }
 0x3b1   : > { %1725 = vmatprep.subr.mxu0 %v1636_v39  ;;  %v2772_v39 = vld [vmem:[%s4849_s9 + $0x1c0] sm:$0xff] }
 0x3b2   : > { %1726 = vmatpush2.msra.mxu0 %v1635_v41  ;;  %v2771_v41 = vld [vmem:[%s4849_s9 + $0x1b8] sm:$0xff] }
 0x3b3   : > { %1727 = vmatprep.subr.mxu0 %v1634_v43  ;;  %v2770_v43 = vld [vmem:[%s4849_s9 + $0x1b0] sm:$0xff] }
 0x3b4   : > { %1728 = vmatpush2.msra.mxu0 %v1633_v45  ;;  %v2769_v45 = vld [vmem:[%s4849_s9 + $0x1a8] sm:$0xff] }
 0x3b5   : > { %1986 = vmatprep.subr.mxu0 %v2795_v48  ;;  %v1882_v48 = vld [vmem:[%s4849_s9 + $0x18] sm:$0xff] }
 0x431   : > { %v1518_v49 = vpop.f32.mrf.mxu0 }
 0x433   : > { %v1520_v50 = vpop.f32.mrf.mxu0 }
 0x435   : > { %v1594_v51 = vpop.f32.mrf.mxu0 }
 0x436   : > { %v1599_v54 = vmax.f32 %v1518_v49, %v1594_v51  ;;  %v2767_v49 = vld [vmem:[%s4849_s9 + $0x198] sm:$0xff]  ;;  %v2766_v51 = vld [vmem:[%s4849_s9 + $0x190] sm:$0xff] }
 0x437   : > { %v1596_v52 = vpop.f32.mrf.mxu0 }
 0x438   : > { %v1600_v53 = vmax.f32 %v1520_v50, %v1596_v52  ;;  %v1881_v50 = vld [vmem:[%s4849_s9 + $0x10] sm:$0xff]  ;;  %v1880_v52 = vld [vmem:[%s4849_s9 + $0x8] sm:$0xff] }
 0x43a   : > { %1729 = vmatprep.mubr.f32.mxu0 %v1600_v53  ;;  %1865 = vmatprep.mubr.f32.mxu1 %v1600_v53  ;;  %v2765_v53 = vld [vmem:[%s4849_s9 + $0x188] sm:$0xff] }
 0x43b   : > { %1730 = vmatmul.mubr.f32.vlgmr.msra.gmra.mxu0 %v1599_v54  ;;  %1866 = vmatmul.mubr.f32.vlgmr.msra.gmra.mxu1 %v1599_v54  ;;  %v1879_v54 = vld [vmem:[%s4849_s9] sm:$0xff] }
 0x43c   : > { %2061 = vmatpush1.msra.mxu1 %v1909_v56  ;;  %1987 = vmatpush1.msra.mxu0 %v2794_v57  ;;  %v2764_v56 = vld [vmem:[%s4849_s9 + $0x180] sm:$0xff]  ;;  %v1926_v57 = vld [vmem:[%s4849_s9 + $0x178] sm:$0xff] }
 0x43d   : > { %2062 = vmatprep.subr.mxu1 %v1908_v58  ;;  %1988 = vmatprep.subr.mxu0 %v2793_v59  ;;  %v2811_v58 = vld [vmem:[%s4849_s9 + $0x2f8] sm:$0xff]  ;;  %v1925_v59 = vld [vmem:[%s4849_s9 + $0x170] sm:$0xff] }
 0x43e   : > { %2063 = vmatpush1.msra.mxu1 %v1907_v60  ;;  %1989 = vmatpush1.msra.mxu0 %v2792_v61  ;;  %v2810_v60 = vld [vmem:[%s4849_s9 + $0x2f0] sm:$0xff]  ;;  %v1924_v61 = vld [vmem:[%s4849_s9 + $0x168] sm:$0xff] }
 0x43f   : > { %2064 = vmatprep.subr.mxu1 %v1906_v62  ;;  %1990 = vmatprep.subr.mxu0 %v2791_v63  ;;  %v2809_v62 = vld [vmem:[%s4849_s9 + $0x2e8] sm:$0xff]  ;;  %v1923_v63 = vld [vmem:[%s4849_s9 + $0x160] sm:$0xff] }
 0x440   : > { %2065 = vmatpush1.msra.mxu1 %v1905_v0  ;;  %1991 = vmatpush1.msra.mxu0 %v2790_v1  ;;  %v2808_v0 = vld [vmem:[%s4849_s9 + $0x2e0] sm:$0xff]  ;;  %v1922_v1 = vld [vmem:[%s4849_s9 + $0x158] sm:$0xff] }
 0x441   : > { %2066 = vmatprep.subr.mxu1 %v1904_v2  ;;  %1992 = vmatprep.subr.mxu0 %v2789_v3  ;;  %v2807_v2 = vld [vmem:[%s4849_s9 + $0x2d8] sm:$0xff]  ;;  %v1921_v3 = vld [vmem:[%s4849_s9 + $0x150] sm:$0xff] }
 0x442   : > { %2067 = vmatpush1.msra.mxu1 %v1903_v4  ;;  %1993 = vmatpush1.msra.mxu0 %v2788_v5  ;;  %v2806_v4 = vld [vmem:[%s4849_s9 + $0x2d0] sm:$0xff]  ;;  %v1920_v5 = vld [vmem:[%s4849_s9 + $0x148] sm:$0xff] }
 0x443   : > { %2068 = vmatprep.subr.mxu1 %v1902_v6  ;;  %1994 = vmatprep.subr.mxu0 %v2787_v7  ;;  %v2805_v6 = vld [vmem:[%s4849_s9 + $0x2c8] sm:$0xff]  ;;  %v1919_v7 = vld [vmem:[%s4849_s9 + $0x140] sm:$0xff] }
 0x444   : > { %2069 = vmatpush1.msra.mxu1 %v1901_v8  ;;  %1995 = vmatpush1.msra.mxu0 %v2786_v9  ;;  %v2804_v8 = vld [vmem:[%s4849_s9 + $0x2c0] sm:$0xff]  ;;  %v1918_v9 = vld [vmem:[%s4849_s9 + $0x138] sm:$0xff] }
 0x445   : > { %2070 = vmatprep.subr.mxu1 %v1900_v10  ;;  %1996 = vmatprep.subr.mxu0 %v2785_v11  ;;  %v2803_v10 = vld [vmem:[%s4849_s9 + $0x2b8] sm:$0xff]  ;;  %v1917_v11 = vld [vmem:[%s4849_s9 + $0x130] sm:$0xff] }
 0x446   : > { %2071 = vmatpush1.msra.mxu1 %v1899_v12  ;;  %1997 = vmatpush1.msra.mxu0 %v2784_v13  ;;  %v2802_v12 = vld [vmem:[%s4849_s9 + $0x2b0] sm:$0xff]  ;;  %v1916_v13 = vld [vmem:[%s4849_s9 + $0x128] sm:$0xff] }
 0x447   : > { %2072 = vmatprep.subr.mxu1 %v1898_v14  ;;  %1998 = vmatprep.subr.mxu0 %v2783_v16  ;;  %v2801_v14 = vld [vmem:[%s4849_s9 + $0x2a8] sm:$0xff]  ;;  %v1915_v16 = vld [vmem:[%s4849_s9 + $0x120] sm:$0xff] }
 0x448   : > { %2073 = vmatpush1.msra.mxu1 %v1897_v18  ;;  %1999 = vmatpush1.msra.mxu0 %v2782_v19  ;;  %v2800_v18 = vld [vmem:[%s4849_s9 + $0x2a0] sm:$0xff]  ;;  %v1914_v19 = vld [vmem:[%s4849_s9 + $0x118] sm:$0xff] }
 0x449   : > { %2074 = vmatprep.subr.mxu1 %v1896_v20  ;;  %2000 = vmatprep.subr.mxu0 %v2781_v21  ;;  %v2799_v20 = vld [vmem:[%s4849_s9 + $0x298] sm:$0xff]  ;;  %v1913_v21 = vld [vmem:[%s4849_s9 + $0x110] sm:$0xff] }
 0x44a   : > { %2075 = vmatpush1.msra.mxu1 %v1895_v22  ;;  %2001 = vmatpush1.msra.mxu0 %v2780_v23  ;;  %v2798_v22 = vld [vmem:[%s4849_s9 + $0x290] sm:$0xff]  ;;  %v1912_v23 = vld [vmem:[%s4849_s9 + $0x108] sm:$0xff] }
 0x44b   : > { %2076 = vmatprep.subr.mxu1 %v1894_v24  ;;  %2002 = vmatprep.subr.mxu0 %v2779_v25  ;;  %v2797_v24 = vld [vmem:[%s4849_s9 + $0x288] sm:$0xff]  ;;  %v1911_v25 = vld [vmem:[%s4849_s9 + $0x100] sm:$0xff] }
 0x44c   : > { %2077 = vmatpush1.msra.mxu1 %v1893_v26  ;;  %2003 = vmatpush1.msra.mxu0 %v2778_v27  ;;  %v2796_v26 = vld [vmem:[%s4849_s9 + $0x280] sm:$0xff]  ;;  %v2845_v27 = vld [vmem:[%s4849_s9 + $0x3f8] sm:$0xff] }
 0x44d   : > { %2078 = vmatprep.subr.mxu1 %v1892_v28  ;;  %2004 = vmatprep.subr.mxu0 %v2777_v29  ;;  %v2309_v28 = vld [vmem:[%s4851_s11 + $0xf8] sm:$0xff] }
 0x44e   : > { %2079 = vmatpush1.msra.mxu1 %v1891_v30  ;;  %2005 = vmatpush1.msra.mxu0 %v2776_v31 }
 0x44f   : > { %2080 = vmatprep.subr.mxu1 %v1890_v32  ;;  %2006 = vmatprep.subr.mxu0 %v2775_v33 }
 0x450   : > { %2081 = vmatpush1.msra.mxu1 %v1889_v34  ;;  %2007 = vmatpush1.msra.mxu0 %v2774_v35 }
 0x451   : > { %2082 = vmatprep.subr.mxu1 %v1888_v36  ;;  %2008 = vmatprep.subr.mxu0 %v2773_v37  ;;  %v2308_v36 = vld [vmem:[%s4851_s11 + $0xf0] sm:$0xff] }
 0x452   : > { %2083 = vmatpush1.msra.mxu1 %v1887_v38  ;;  %2009 = vmatpush1.msra.mxu0 %v2772_v39 }
 0x453   : > { %2084 = vmatprep.subr.mxu1 %v1886_v40  ;;  %2010 = vmatprep.subr.mxu0 %v2771_v41 }
 0x454   : > { %2085 = vmatpush1.msra.mxu1 %v1885_v42  ;;  %2011 = vmatpush1.msra.mxu0 %v2770_v43  ;;  %v2307_v42 = vld [vmem:[%s4851_s11 + $0xe8] sm:$0xff] }
 0x455   : > { %2086 = vmatprep.subr.mxu1 %v1884_v44  ;;  %2012 = vmatprep.subr.mxu0 %v2769_v45  ;;  %v2844_v44 = vld [vmem:[%s4849_s9 + $0x3f0] sm:$0xff]  ;;  %v2843_v45 = vld [vmem:[%s4849_s9 + $0x3e8] sm:$0xff] }
 0x456   : > { %2087 = vmatpush1.msra.mxu1 %v1883_v46  ;;  %2013 = vmatpush1.msra.mxu0 %v2768_v47  ;;  %v2306_v47 = vld [vmem:[%s4851_s11 + $0xe0] sm:$0xff] }
 0x457   : > { %2088 = vmatprep.subr.mxu1 %v1882_v48  ;;  %2014 = vmatprep.subr.mxu0 %v2767_v49  ;;  %v2842_v48 = vld [vmem:[%s4849_s9 + $0x3e0] sm:$0xff]  ;;  %v2305_v49 = vld [vmem:[%s4851_s11 + $0xd8] sm:$0xff] }
 0x458   : > { %2089 = vmatpush1.msra.mxu1 %v1881_v50  ;;  %2015 = vmatpush1.msra.mxu0 %v2766_v51  ;;  %v2841_v50 = vld [vmem:[%s4849_s9 + $0x3d8] sm:$0xff]  ;;  %v2840_v51 = vld [vmem:[%s4849_s9 + $0x3d0] sm:$0xff] }
 0x459   : > { %2090 = vmatprep.subr.mxu1 %v1880_v52  ;;  %2016 = vmatprep.subr.mxu0 %v2765_v53  ;;  %v2839_v52 = vld [vmem:[%s4849_s9 + $0x3c8] sm:$0xff]  ;;  %v2838_v53 = vld [vmem:[%s4849_s9 + $0x3c0] sm:$0xff] }
 0x45a   : > { %2091 = vmatpush1.msra.mxu1 %v1879_v54  ;;  %2017 = vmatpush1.msra.mxu0 %v2764_v56  ;;  %v2837_v54 = vld [vmem:[%s4849_s9 + $0x3b8] sm:$0xff]  ;;  %v2836_v56 = vld [vmem:[%s4849_s9 + $0x3b0] sm:$0xff] }
 0x45b   : > { %2108 = vmatprep.subr.mxu1 %v1926_v57  ;;  %2034 = vmatprep.subr.mxu0 %v2811_v58  ;;  %v2835_v57 = vld [vmem:[%s4849_s9 + $0x3a8] sm:$0xff]  ;;  %v2834_v58 = vld [vmem:[%s4849_s9 + $0x3a0] sm:$0xff] }
 0x45c   : > { %2109 = vmatpush2.msra.mxu1 %v1925_v59  ;;  %2035 = vmatpush2.msra.mxu0 %v2810_v60  ;;  %v2833_v59 = vld [vmem:[%s4849_s9 + $0x398] sm:$0xff]  ;;  %v2832_v60 = vld [vmem:[%s4849_s9 + $0x390] sm:$0xff] }
 0x45d   : > { %2110 = vmatprep.subr.mxu1 %v1924_v61  ;;  %2036 = vmatprep.subr.mxu0 %v2809_v62  ;;  %v2831_v61 = vld [vmem:[%s4849_s9 + $0x388] sm:$0xff]  ;;  %v2830_v62 = vld [vmem:[%s4849_s9 + $0x380] sm:$0xff] }
 0x45e   : > { %2111 = vmatpush2.msra.mxu1 %v1923_v63  ;;  %2037 = vmatpush2.msra.mxu0 %v2808_v0  ;;  %v2829_v63 = vld [vmem:[%s4849_s9 + $0x378] sm:$0xff]  ;;  %v2828_v0 = vld [vmem:[%s4849_s9 + $0x370] sm:$0xff] }
 0x45f   : > { %2112 = vmatprep.subr.mxu1 %v1922_v1  ;;  %2038 = vmatprep.subr.mxu0 %v2807_v2  ;;  %v2827_v1 = vld [vmem:[%s4849_s9 + $0x368] sm:$0xff]  ;;  %v2826_v2 = vld [vmem:[%s4849_s9 + $0x360] sm:$0xff] }
 0x460   : > { %2113 = vmatpush2.msra.mxu1 %v1921_v3  ;;  %2039 = vmatpush2.msra.mxu0 %v2806_v4  ;;  %v2825_v3 = vld [vmem:[%s4849_s9 + $0x358] sm:$0xff]  ;;  %v2824_v4 = vld [vmem:[%s4849_s9 + $0x350] sm:$0xff] }
 0x461   : > { %2114 = vmatprep.subr.mxu1 %v1920_v5  ;;  %2040 = vmatprep.subr.mxu0 %v2805_v6  ;;  %v2823_v5 = vld [vmem:[%s4849_s9 + $0x348] sm:$0xff]  ;;  %v2822_v6 = vld [vmem:[%s4849_s9 + $0x340] sm:$0xff] }
 0x462   : > { %2115 = vmatpush2.msra.mxu1 %v1919_v7  ;;  %2041 = vmatpush2.msra.mxu0 %v2804_v8  ;;  %v2821_v7 = vld [vmem:[%s4849_s9 + $0x338] sm:$0xff]  ;;  %v2820_v8 = vld [vmem:[%s4849_s9 + $0x330] sm:$0xff] }
 0x463   : > { %2116 = vmatprep.subr.mxu1 %v1918_v9  ;;  %2042 = vmatprep.subr.mxu0 %v2803_v10  ;;  %v2819_v9 = vld [vmem:[%s4849_s9 + $0x328] sm:$0xff]  ;;  %v2818_v10 = vld [vmem:[%s4849_s9 + $0x320] sm:$0xff] }
 0x464   : > { %2117 = vmatpush2.msra.mxu1 %v1917_v11  ;;  %2043 = vmatpush2.msra.mxu0 %v2802_v12  ;;  %v2817_v11 = vld [vmem:[%s4849_s9 + $0x318] sm:$0xff]  ;;  %v2816_v12 = vld [vmem:[%s4849_s9 + $0x310] sm:$0xff] }
 0x465   : > { %2118 = vmatprep.subr.mxu1 %v1916_v13  ;;  %2044 = vmatprep.subr.mxu0 %v2801_v14  ;;  %v2815_v13 = vld [vmem:[%s4849_s9 + $0x308] sm:$0xff]  ;;  %v2814_v14 = vld [vmem:[%s4849_s9 + $0x300] sm:$0xff] }
 0x466   : > { %2119 = vmatpush2.msra.mxu1 %v1915_v16  ;;  %2045 = vmatpush2.msra.mxu0 %v2800_v18  ;;  %v2861_v16 = vld [vmem:[%s4849_s9 + $0x478] sm:$0xff]  ;;  %v2860_v18 = vld [vmem:[%s4849_s9 + $0x470] sm:$0xff] }
 0x467   : > { %2120 = vmatprep.subr.mxu1 %v1914_v19  ;;  %2046 = vmatprep.subr.mxu0 %v2799_v20  ;;  %v2859_v19 = vld [vmem:[%s4849_s9 + $0x468] sm:$0xff]  ;;  %v2858_v20 = vld [vmem:[%s4849_s9 + $0x460] sm:$0xff] }
 0x468   : > { %2121 = vmatpush2.msra.mxu1 %v1913_v21  ;;  %2047 = vmatpush2.msra.mxu0 %v2798_v22  ;;  %v2857_v21 = vld [vmem:[%s4849_s9 + $0x458] sm:$0xff]  ;;  %v2856_v22 = vld [vmem:[%s4849_s9 + $0x450] sm:$0xff] }
 0x469   : > { %2122 = vmatprep.subr.mxu1 %v1912_v23  ;;  %2048 = vmatprep.subr.mxu0 %v2797_v24  ;;  %v2855_v23 = vld [vmem:[%s4849_s9 + $0x448] sm:$0xff]  ;;  %v2854_v24 = vld [vmem:[%s4849_s9 + $0x440] sm:$0xff] }
 0x46a   : > { %2123 = vmatpush2.msra.mxu1 %v1911_v25  ;;  %2049 = vmatpush2.msra.mxu0 %v2796_v26  ;;  %v2853_v25 = vld [vmem:[%s4849_s9 + $0x438] sm:$0xff]  ;;  %v2852_v26 = vld [vmem:[%s4849_s9 + $0x430] sm:$0xff] }
 0x46b   : > { %2189 = vmatprep.subr.mxu0 %v2845_v27  ;;  %2354 = vmatprep.subr.mxu1 %v2309_v28  ;;  %v2851_v27 = vld [vmem:[%s4849_s9 + $0x428] sm:$0xff]  ;;  %v2850_v28 = vld [vmem:[%s4849_s9 + $0x420] sm:$0xff] }
 0x4fb   : > { %v1731_v29 = vpop.f32.mrf.mxu0  ;;  %v1867_v30 = vpop.f32.mrf.mxu1 }
 0x4fc   : > { %v1872_v31 = vmax.f32 %v1731_v29, %v1867_v30  ;;  %v2849_v29 = vld [vmem:[%s4849_s9 + $0x418] sm:$0xff]  ;;  %v2848_v30 = vld [vmem:[%s4849_s9 + $0x410] sm:$0xff] }
 0x4fd   : > { %v1733_v32 = vpop.f32.mrf.mxu0  ;;  %v1869_v33 = vpop.f32.mrf.mxu1 }
 0x4fe   : > { %1874 = vst [vmem:[#allocation3] sm:$0x3f] %v1872_v31  ;;  %v1873_v34 = vmax.f32 %v1733_v32, %v1869_v33  ;;  %v2847_v31 = vld [vmem:[%s4849_s9 + $0x408] sm:$0xff]  ;;  %v2846_v33 = vld [vmem:[%s4849_s9 + $0x400] sm:$0xff] }
 0x500   : > { %1876 = vst.msk [vmem:[#allocation3 + $0x8] sm:$0x3f] %vm1875_vm6, %v1873_v34 }
 0x505   : > { %v1927_v35 = vld [vmem:[#allocation3] sm:$0x1e] }
 0x506   : > { %v1877_v40 = vld [vmem:[#allocation3] sm:$0xf]  ;;  %v1980_v43 = vrot.slane %v1927_v35, 1 }
 0x507   : > { %v1878_v37 = vld [vmem:[#allocation3 + $0x8] sm:$0xf]  ;;  %v2131_v32 = vld [vmem:[#allocation3] sm:$0x3c] }
 0x508   : > { %v1928_v38 = vld [vmem:[#allocation3 + $0x8] sm:$0x1e]  ;;  %2813 = vmatprep.mubr.msk.f32.mxu1 %vm1983_vm7, %v1878_v37  ;;  %v2184_v34 = vrot.slane %v2131_v32, 2  ;;  %v2304_v35 = vld [vmem:[%s4851_s11 + $0xd0] sm:$0xff]  ;;  %v2302_v37 = vld [vmem:[%s4851_s11 + $0xc0] sm:$0xff] }
 0x509   : > { %v2132_v39 = vld [vmem:[#allocation3 + $0x8] sm:$0x3c]  ;;  %v1981_v41 = vrot.slane %v1928_v38, 1  ;;  %2125 = vmatmul.mubr.f32.vlgmr.msra.gmra.mxu1 %v1877_v40  ;;  %v2299_v40 = vld [vmem:[%s4851_s11 + $0xa8] sm:$0xff]  ;;  %v2310_v32 = vld [vmem:[%s4851_s11 + $0x100] sm:$0xff] }
 0x50a   : > { %v2185_v46 = vrot.slane %v2132_v39, 2  ;;  %2355 = vmatpush1.msra.mxu1 %v2308_v36  ;;  %v2303_v36 = vld [vmem:[%s4851_s11 + $0xc8] sm:$0xff]  ;;  %v2301_v38 = vld [vmem:[%s4851_s11 + $0xb8] sm:$0xff]  ;;  %v2300_v39 = vld [vmem:[%s4851_s11 + $0xb0] sm:$0xff] }
 0x50b   : > { %2812 = vmatprep.mubr.msk.f32.mxu0 %vm1983_vm7, %v1981_v41  ;;  %2356 = vmatprep.subr.mxu1 %v2307_v42  ;;  %v2298_v41 = vld [vmem:[%s4851_s11 + $0xa0] sm:$0xff]  ;;  %v2297_v42 = vld [vmem:[%s4851_s11 + $0x98] sm:$0xff] }
 0x50c   : > { %2051 = vmatmul.mubr.f32.vlgmr.msra.gmra.mxu0 %v1980_v43  ;;  %2357 = vmatpush1.msra.mxu1 %v2306_v47  ;;  %v2296_v43 = vld [vmem:[%s4851_s11 + $0x90] sm:$0xff] }
 0x50d   : > { %2190 = vmatpush1.msra.mxu0 %v2844_v44  ;;  %2862 = vmatprep.mubr.msk.f32.mxu0 %vm1983_vm7, %v2185_v46  ;;  %v2295_v44 = vld [vmem:[%s4851_s11 + $0x88] sm:$0xff]  ;;  %v2293_v46 = vld [vmem:[%s4851_s11 + $0x78] sm:$0xff]  ;;  %v2292_v47 = vld [vmem:[%s4851_s11 + $0x70] sm:$0xff] }
 0x50e   : > { %2191 = vmatprep.subr.mxu0 %v2843_v45  ;;  %2358 = vmatprep.subr.mxu1 %v2305_v49  ;;  %v2294_v45 = vld [vmem:[%s4851_s11 + $0x80] sm:$0xff] }
 0x50f   : > { %2192 = vmatpush1.msra.mxu0 %v2842_v48  ;;  %2359 = vmatpush1.msra.mxu1 %v2304_v35  ;;  %v2291_v48 = vld [vmem:[%s4851_s11 + $0x68] sm:$0xff]  ;;  %v2290_v49 = vld [vmem:[%s4851_s11 + $0x60] sm:$0xff] }
 0x510   : > { %2193 = vmatprep.subr.mxu0 %v2841_v50  ;;  %2360 = vmatprep.subr.mxu1 %v2303_v36  ;;  %v2289_v50 = vld [vmem:[%s4851_s11 + $0x58] sm:$0xff]  ;;  %v2440_v35 = vld [vmem:[%s4853_s13 + $0x68] sm:$0xff]  ;;  %v2439_v36 = vld [vmem:[%s4853_s13 + $0x60] sm:$0xff] }
 0x511   : > { %2194 = vmatpush1.msra.mxu0 %v2840_v51  ;;  %2361 = vmatpush1.msra.mxu1 %v2302_v37  ;;  %v2288_v51 = vld [vmem:[%s4851_s11 + $0x50] sm:$0xff]  ;;  %v2438_v37 = vld [vmem:[%s4853_s13 + $0x58] sm:$0xff] }
 0x512   : > { %2195 = vmatprep.subr.mxu0 %v2839_v52  ;;  %2362 = vmatprep.subr.mxu1 %v2301_v38  ;;  %v2287_v52 = vld [vmem:[%s4851_s11 + $0x48] sm:$0xff]  ;;  %v2437_v38 = vld [vmem:[%s4853_s13 + $0x50] sm:$0xff] }
 0x513   : > { %2196 = vmatpush1.msra.mxu0 %v2838_v53  ;;  %2363 = vmatpush1.msra.mxu1 %v2300_v39  ;;  %v2286_v53 = vld [vmem:[%s4851_s11 + $0x40] sm:$0xff]  ;;  %v2436_v39 = vld [vmem:[%s4853_s13 + $0x48] sm:$0xff] }
 0x514   : > { %2197 = vmatprep.subr.mxu0 %v2837_v54  ;;  %2364 = vmatprep.subr.mxu1 %v2299_v40  ;;  %v2285_v54 = vld [vmem:[%s4851_s11 + $0x38] sm:$0xff]  ;;  %v2435_v40 = vld [vmem:[%s4853_s13 + $0x40] sm:$0xff] }
 0x515   : > { %2198 = vmatpush1.msra.mxu0 %v2836_v56  ;;  %2365 = vmatpush1.msra.mxu1 %v2298_v41  ;;  %v2284_v56 = vld [vmem:[%s4851_s11 + $0x30] sm:$0xff]  ;;  %v2434_v41 = vld [vmem:[%s4853_s13 + $0x38] sm:$0xff] }
 0x516   : > { %2199 = vmatprep.subr.mxu0 %v2835_v57  ;;  %2366 = vmatprep.subr.mxu1 %v2297_v42  ;;  %v2283_v57 = vld [vmem:[%s4851_s11 + $0x28] sm:$0xff]  ;;  %v2433_v42 = vld [vmem:[%s4853_s13 + $0x30] sm:$0xff] }
 0x517   : > { %2200 = vmatpush1.msra.mxu0 %v2834_v58  ;;  %2367 = vmatpush1.msra.mxu1 %v2296_v43  ;;  %v2282_v58 = vld [vmem:[%s4851_s11 + $0x20] sm:$0xff]  ;;  %v2432_v43 = vld [vmem:[%s4853_s13 + $0x28] sm:$0xff] }
 0x518   : > { %2201 = vmatprep.subr.mxu0 %v2833_v59  ;;  %2368 = vmatprep.subr.mxu1 %v2295_v44  ;;  %v2281_v59 = vld [vmem:[%s4851_s11 + $0x18] sm:$0xff]  ;;  %v2431_v44 = vld [vmem:[%s4853_s13 + $0x20] sm:$0xff] }
 0x519   : > { %2202 = vmatpush1.msra.mxu0 %v2832_v60  ;;  %2369 = vmatpush1.msra.mxu1 %v2294_v45  ;;  %v2280_v60 = vld [vmem:[%s4851_s11 + $0x10] sm:$0xff]  ;;  %v2430_v45 = vld [vmem:[%s4853_s13 + $0x18] sm:$0xff] }
 0x51a   : > { %2203 = vmatprep.subr.mxu0 %v2831_v61  ;;  %2370 = vmatprep.subr.mxu1 %v2293_v46  ;;  %v2279_v61 = vld [vmem:[%s4851_s11 + $0x8] sm:$0xff]  ;;  %v2429_v46 = vld [vmem:[%s4853_s13 + $0x10] sm:$0xff] }
 0x51b   : > { %2204 = vmatpush1.msra.mxu0 %v2830_v62  ;;  %2371 = vmatpush1.msra.mxu1 %v2292_v47  ;;  %v2278_v62 = vld [vmem:[%s4851_s11] sm:$0xff]  ;;  %v2428_v47 = vld [vmem:[%s4853_s13 + $0x8] sm:$0xff] }
 0x51c   : > { %2205 = vmatprep.subr.mxu0 %v2829_v63  ;;  %2372 = vmatprep.subr.mxu1 %v2291_v48  ;;  %v2341_v63 = vld [vmem:[%s4851_s11 + $0x1f8] sm:$0xff]  ;;  %v2427_v48 = vld [vmem:[%s4853_s13] sm:$0xff] }
 0x51d   : > { %2206 = vmatpush1.msra.mxu0 %v2828_v0  ;;  %2373 = vmatpush1.msra.mxu1 %v2290_v49  ;;  %v2340_v0 = vld [vmem:[%s4851_s11 + $0x1f0] sm:$0xff]  ;;  %v2450_v49 = vld [vmem:[%s4853_s13 + $0xb8] sm:$0xff] }
 0x51e   : > { %2207 = vmatprep.subr.mxu0 %v2827_v1  ;;  %2374 = vmatprep.subr.mxu1 %v2289_v50  ;;  %v2339_v1 = vld [vmem:[%s4851_s11 + $0x1e8] sm:$0xff]  ;;  %v2449_v50 = vld [vmem:[%s4853_s13 + $0xb0] sm:$0xff] }
 0x51f   : > { %2208 = vmatpush1.msra.mxu0 %v2826_v2  ;;  %2375 = vmatpush1.msra.mxu1 %v2288_v51  ;;  %v2338_v2 = vld [vmem:[%s4851_s11 + $0x1e0] sm:$0xff]  ;;  %v2448_v51 = vld [vmem:[%s4853_s13 + $0xa8] sm:$0xff] }
 0x520   : > { %2209 = vmatprep.subr.mxu0 %v2825_v3  ;;  %2376 = vmatprep.subr.mxu1 %v2287_v52  ;;  %v2337_v3 = vld [vmem:[%s4851_s11 + $0x1d8] sm:$0xff]  ;;  %v2447_v52 = vld [vmem:[%s4853_s13 + $0xa0] sm:$0xff] }
 0x521   : > { %2210 = vmatpush1.msra.mxu0 %v2824_v4  ;;  %2377 = vmatpush1.msra.mxu1 %v2286_v53  ;;  %v2336_v4 = vld [vmem:[%s4851_s11 + $0x1d0] sm:$0xff] }
 0x522   : > { %2211 = vmatprep.subr.mxu0 %v2823_v5  ;;  %2378 = vmatprep.subr.mxu1 %v2285_v54  ;;  %v2335_v5 = vld [vmem:[%s4851_s11 + $0x1c8] sm:$0xff] }
 0x523   : > { %2212 = vmatpush1.msra.mxu0 %v2822_v6  ;;  %2379 = vmatpush1.msra.mxu1 %v2284_v56  ;;  %v2334_v6 = vld [vmem:[%s4851_s11 + $0x1c0] sm:$0xff] }
 0x524   : > { %2213 = vmatprep.subr.mxu0 %v2821_v7  ;;  %2380 = vmatprep.subr.mxu1 %v2283_v57  ;;  %v2333_v7 = vld [vmem:[%s4851_s11 + $0x1b8] sm:$0xff]  ;;  %v2262_v56 = vld [vmem:[%s4850_s10] sm:$0x3] }
 0x525   : > { %2214 = vmatpush1.msra.mxu0 %v2820_v8  ;;  %2381 = vmatpush1.msra.mxu1 %v2282_v58  ;;  %v2332_v8 = vld [vmem:[%s4851_s11 + $0x1b0] sm:$0xff] }
 0x526   : > { %2215 = vmatprep.subr.mxu0 %v2819_v9  ;;  %2382 = vmatprep.subr.mxu1 %v2281_v59  ;;  %v2331_v9 = vld [vmem:[%s4851_s11 + $0x1a8] sm:$0xff] }
 0x527   : > { %2216 = vmatpush1.msra.mxu0 %v2818_v10  ;;  %2383 = vmatpush1.msra.mxu1 %v2280_v60  ;;  %v2330_v10 = vld [vmem:[%s4851_s11 + $0x1a0] sm:$0xff] }
 0x528   : > { %2217 = vmatprep.subr.mxu0 %v2817_v11  ;;  %2384 = vmatprep.subr.mxu1 %v2279_v61  ;;  %v2329_v11 = vld [vmem:[%s4851_s11 + $0x198] sm:$0xff]  ;;  %v2267_v61 = vrot.slane %v2262_v56, %v3825_v15 }
 0x529   : > { %2218 = vmatpush1.msra.mxu0 %v2816_v12  ;;  %2385 = vmatpush1.msra.mxu1 %v2278_v62  ;;  %v2328_v12 = vld [vmem:[%s4851_s11 + $0x190] sm:$0xff] }
 0x52a   : > { %2219 = vmatprep.subr.mxu0 %v2815_v13  ;;  %2386 = vmatprep.subr.mxu1 %v2341_v63  ;;  %v2327_v13 = vld [vmem:[%s4851_s11 + $0x188] sm:$0xff] }
 0x52b   : > { %2220 = vmatpush1.msra.mxu0 %v2814_v14  ;;  %2387 = vmatpush2.msra.mxu1 %v2340_v0  ;;  %v2326_v14 = vld [vmem:[%s4851_s11 + $0x180] sm:$0xff]  ;;  %v2271_v0 = vrot.slane %v2262_v56, %v3830_v17 }
 0x52c   : > { %2237 = vmatprep.subr.mxu0 %v2861_v16  ;;  %2388 = vmatprep.subr.mxu1 %v2339_v1  ;;  %v2325_v16 = vld [vmem:[%s4851_s11 + $0x178] sm:$0xff] }
 0x52d   : > { %2238 = vmatpush2.msra.mxu0 %v2860_v18  ;;  %2389 = vmatpush2.msra.mxu1 %v2338_v2  ;;  %v2324_v18 = vld [vmem:[%s4851_s11 + $0x170] sm:$0xff] }
 0x52e   : > { %2239 = vmatprep.subr.mxu0 %v2859_v19  ;;  %2390 = vmatprep.subr.mxu1 %v2337_v3  ;;  %v2323_v19 = vld [vmem:[%s4851_s11 + $0x168] sm:$0xff] }
 0x52f   : > { %2240 = vmatpush2.msra.mxu0 %v2858_v20  ;;  %2391 = vmatpush2.msra.mxu1 %v2336_v4  ;;  %v2322_v20 = vld [vmem:[%s4851_s11 + $0x160] sm:$0xff] }
 0x530   : > { %2241 = vmatprep.subr.mxu0 %v2857_v21  ;;  %2392 = vmatprep.subr.mxu1 %v2335_v5  ;;  %v2321_v21 = vld [vmem:[%s4851_s11 + $0x158] sm:$0xff] }
 0x531   : > { %2242 = vmatpush2.msra.mxu0 %v2856_v22  ;;  %2393 = vmatpush2.msra.mxu1 %v2334_v6  ;;  %v2320_v22 = vld [vmem:[%s4851_s11 + $0x150] sm:$0xff] }
 0x532   : > { %2243 = vmatprep.subr.mxu0 %v2855_v23  ;;  %2394 = vmatprep.subr.mxu1 %v2333_v7  ;;  %v2319_v23 = vld [vmem:[%s4851_s11 + $0x148] sm:$0xff]  ;;  %v2446_v7 = vld [vmem:[%s4853_s13 + $0x98] sm:$0xff] }
 0x533   : > { %2244 = vmatpush2.msra.mxu0 %v2854_v24  ;;  %2395 = vmatpush2.msra.mxu1 %v2332_v8  ;;  %v2318_v24 = vld [vmem:[%s4851_s11 + $0x140] sm:$0xff]  ;;  %v2445_v8 = vld [vmem:[%s4853_s13 + $0x90] sm:$0xff] }
 0x534   : > { %2245 = vmatprep.subr.mxu0 %v2853_v25  ;;  %2396 = vmatprep.subr.mxu1 %v2331_v9  ;;  %v2317_v25 = vld [vmem:[%s4851_s11 + $0x138] sm:$0xff]  ;;  %v2444_v9 = vld [vmem:[%s4853_s13 + $0x88] sm:$0xff] }
 0x535   : > { %2246 = vmatpush2.msra.mxu0 %v2852_v26  ;;  %2397 = vmatpush2.msra.mxu1 %v2330_v10  ;;  %v2316_v26 = vld [vmem:[%s4851_s11 + $0x130] sm:$0xff]  ;;  %v2443_v10 = vld [vmem:[%s4853_s13 + $0x80] sm:$0xff] }
 0x536   : > { %2247 = vmatprep.subr.mxu0 %v2851_v27  ;;  %2398 = vmatprep.subr.mxu1 %v2329_v11  ;;  %v2315_v27 = vld [vmem:[%s4851_s11 + $0x128] sm:$0xff]  ;;  %v2342_v11 = vld [vmem:[%s4852_s12] sm:$0x3] }
 0x537   : > { %2248 = vmatpush2.msra.mxu0 %v2850_v28  ;;  %2399 = vmatpush2.msra.mxu1 %v2328_v12  ;;  %v2314_v28 = vld [vmem:[%s4851_s11 + $0x120] sm:$0xff]  ;;  %v2347_v12 = vrot.slane %v2342_v11, %v3825_v15 }
 0x538   : > { %2249 = vmatprep.subr.mxu0 %v2849_v29  ;;  %2400 = vmatprep.subr.mxu1 %v2327_v13  ;;  %v2313_v29 = vld [vmem:[%s4851_s11 + $0x118] sm:$0xff]  ;;  %v2351_v13 = vrot.slane %v2342_v11, %v3830_v17 }
 0x539   : > { %2250 = vmatpush2.msra.mxu0 %v2848_v30  ;;  %2401 = vmatpush2.msra.mxu1 %v2326_v14  ;;  %v2312_v30 = vld [vmem:[%s4851_s11 + $0x110] sm:$0xff] }
 0x53a   : > { %2251 = vmatprep.subr.mxu0 %v2847_v31  ;;  %2402 = vmatprep.subr.mxu1 %v2325_v16  ;;  %v2311_v31 = vld [vmem:[%s4851_s11 + $0x108] sm:$0xff] }
 0x53b   : > { %2252 = vmatpush2.msra.mxu0 %v2846_v33  ;;  %2403 = vmatpush2.msra.mxu1 %v2324_v18  ;;  %v2442_v33 = vld [vmem:[%s4853_s13 + $0x78] sm:$0xff] }
 0x53c   : > { %2254 = vmatmul.mubr.f32.vlgmr.msra.gmra.mxu0 %v2184_v34  ;;  %2461 = vmatprep.subr.mxu0 %v3160_v55  ;;  %v2441_v34 = vld [vmem:[%s4853_s13 + $0x70] sm:$0xff] }
 0x53d   : > { %2404 = vmatprep.subr.mxu1 %v2323_v19  ;;  %2462 = vmatpush1.msra.mxu0 %v2442_v33 }
 0x53e   : > { %2405 = vmatpush2.msra.mxu1 %v2322_v20  ;;  %2463 = vmatprep.subr.mxu0 %v3160_v55 }
 0x53f   : > { %2406 = vmatprep.subr.mxu1 %v2321_v21  ;;  %2464 = vmatpush1.msra.mxu0 %v2441_v34 }
 0x540   : > { %2407 = vmatpush2.msra.mxu1 %v2320_v22  ;;  %2465 = vmatprep.subr.mxu0 %v3160_v55 }
 0x541   : > { %2408 = vmatprep.subr.mxu1 %v2319_v23  ;;  %2466 = vmatpush1.msra.mxu0 %v2440_v35 }
 0x542   : > { %2409 = vmatpush2.msra.mxu1 %v2318_v24  ;;  %2467 = vmatprep.subr.mxu0 %v3160_v55 }
 0x543   : > { %2410 = vmatprep.subr.mxu1 %v2317_v25  ;;  %2468 = vmatpush1.msra.mxu0 %v2439_v36 }
 0x544   : > { %2411 = vmatpush2.msra.mxu1 %v2316_v26  ;;  %2469 = vmatprep.subr.mxu0 %v3160_v55 }
 0x545   : > { %2412 = vmatprep.subr.mxu1 %v2315_v27  ;;  %2470 = vmatpush1.msra.mxu0 %v2438_v37 }
 0x546   : > { %2413 = vmatpush2.msra.mxu1 %v2314_v28  ;;  %2471 = vmatprep.subr.mxu0 %v3160_v55 }
 0x547   : > { %2414 = vmatprep.subr.mxu1 %v2313_v29  ;;  %2472 = vmatpush1.msra.mxu0 %v2437_v38 }
 0x548   : > { %2415 = vmatpush2.msra.mxu1 %v2312_v30  ;;  %2473 = vmatprep.subr.mxu0 %v3160_v55 }
 0x549   : > { %2416 = vmatprep.subr.mxu1 %v2311_v31  ;;  %2474 = vmatpush1.msra.mxu0 %v2436_v39 }
 0x54a   : > { %2417 = vmatpush2.msra.mxu1 %v2310_v32  ;;  %2475 = vmatprep.subr.mxu0 %v3160_v55 }
 0x54b   : > { %2476 = vmatpush1.msra.mxu0 %v2435_v40 }
 0x54c   : > { %2477 = vmatprep.subr.mxu0 %v3160_v55 }
 0x54d   : > { %2478 = vmatpush1.msra.mxu0 %v2434_v41 }
 0x54e   : > { %2479 = vmatprep.subr.mxu0 %v3160_v55 }
 0x54f   : > { %2480 = vmatpush1.msra.mxu0 %v2433_v42 }
 0x550   : > { %2481 = vmatprep.subr.mxu0 %v3160_v55 }
 0x551   : > { %2482 = vmatpush1.msra.mxu0 %v2432_v43 }
 0x552   : > { %2483 = vmatprep.subr.mxu0 %v3160_v55 }
 0x553   : > { %2484 = vmatpush1.msra.mxu0 %v2431_v44 }
 0x554   : > { %2485 = vmatprep.subr.mxu0 %v3160_v55 }
 0x555   : > { %2486 = vmatpush1.msra.mxu0 %v2430_v45 }
 0x556   : > { %2487 = vmatprep.subr.mxu0 %v3160_v55 }
 0x557   : > { %2488 = vmatpush1.msra.mxu0 %v2429_v46 }
 0x558   : > { %2489 = vmatprep.subr.mxu0 %v3160_v55 }
 0x559   : > { %2490 = vmatpush1.msra.mxu0 %v2428_v47 }
 0x55a   : > { %2491 = vmatprep.subr.mxu0 %v3160_v55 }
 0x55b   : > { %2492 = vmatpush1.msra.mxu0 %v2427_v48 }
 0x55c   : > { %2509 = vmatprep.subr.mxu0 %v3160_v55 }
 0x55d   : > { %2510 = vmatpush2.msra.mxu0 %v2450_v49 }
 0x55e   : > { %2511 = vmatprep.subr.mxu0 %v3160_v55 }
 0x55f   : > { %2512 = vmatpush2.msra.mxu0 %v2449_v50 }
 0x560   : > { %2513 = vmatprep.subr.mxu0 %v3160_v55 }
 0x561   : > { %2514 = vmatpush2.msra.mxu0 %v2448_v51 }
 0x562   : > { %2515 = vmatprep.subr.mxu0 %v3160_v55 }
 0x563   : > { %2516 = vmatpush2.msra.mxu0 %v2447_v52 }
 0x564   : > { %2517 = vmatprep.subr.mxu0 %v3160_v55 }
 0x565   : > { %2518 = vmatpush2.msra.mxu0 %v2446_v7 }
 0x566   : > { %2519 = vmatprep.subr.mxu0 %v3160_v55 }
 0x567   : > { %2520 = vmatpush2.msra.mxu0 %v2445_v8 }
 0x568   : > { %2521 = vmatprep.subr.mxu0 %v3160_v55 }
 0x569   : > { %2522 = vmatpush2.msra.mxu0 %v2444_v9 }
 0x56a   : > { %2523 = vmatprep.subr.mxu0 %v3160_v55  ;;  %v2863_v55 = vld [vmem:[%s4854_s14] ss:$0 sm:$0xff] }
 0x56b   : > { %2524 = vmatpush2.msra.mxu0 %v2443_v10 }
 0x5c9   : > { %v2126_v54 = vpop.f32.mrf.mxu1 }
 0x5cb   : > { %v2128_v59 = vpop.f32.mrf.mxu1 }
 0x5cc   : > { %v2052_v53 = vpop.f32.mrf.mxu0 }
 0x5cd   : > { %v2127_v58 = vadd.f32 %v2126_v54, %v2052_v53 }
 0x5ce   : > { %v2054_v57 = vpop.f32.mrf.mxu0 }
 0x5cf   : > { %v2129_v62 = vadd.f32 %v2128_v59, %v2054_v57 }
 0x5fc   : > { %v2255_v60 = vpop.f32.mrf.mxu0 }
 0x5fd   : > { %v2260_v63 = vadd.f32 %v2255_v60, %v2127_v58 }
 0x5fe   : > { %v2257_v1 = vpop.f32.mrf.mxu0 }
 0x5ff   : > { %v2261_v2 = vadd.f32 %v2257_v1, %v2129_v62  ;;  %v2274_v3 = vadd.f32 %v2267_v61, %v2260_v63 }
 0x601   : > { %v2275_v4 = vadd.f32 %v2271_v0, %v2261_v2  ;;  %v2276_v6 = vmax.f32 %v2274_v3, 0.0 }
 0x603   : > { %v2277_v5 = vmax.f32 %v2275_v4, 0.0 }
 0x605   : > { %2418 = vmatprep.mubr.f32.mxu1 %v2277_v5 }
 0x606   : > { %2419 = vmatmul.mubr.f32.vlgmr.msra.gmra.mxu1 %v2276_v6 }
 0x6c6   : > { %v2420_v14 = vpop.f32.mrf.mxu1 }
 0x6c7   : > { %v2421_v16 = vadd.f32 %v2420_v14, %v2347_v12 }
 0x6c8   : > { %v2422_v18 = vpop.f32.mrf.mxu1 }
 0x6c9   : > { %v2423_v19 = vadd.f32 %v2422_v18, %v2351_v13  ;;  %v2425_v21 = vmax.f32 %v2421_v16, 0.0 }
 0x6cb   : > { %v2426_v20 = vmax.f32 %v2423_v19, 0.0 }
 0x6cd   : > { %2864 = vmatprep.mubr.msk.f32.mxu0 %vm1983_vm7, %v2426_v20 }
 0x6ce   : > { %2526 = vmatmul.mubr.f32.vlgmr.msra.gmra.mxu0 %v2425_v21 }
 0x78e   : > { %v2527_v15 = vpop.f32.mrf.mxu0 }
 0x78f   : > { %v2528_v17 = vadd.f32 %v2863_v55, %v2527_v15 }
 0x790   : > { %v2529_v22 = vpop.f32.mrf.mxu0 }
 0x791   : > { %2532 = vst.msk [vmem:[%s487_s29] sm:$0xf] %vm2531_vm8, %v2528_v17 }
 0x792   : > { %3111 = shalt.err (!%p3108_p3)
}
 0x793   : > { %s3112_s25 = scalar_lea.hbm %s4805_s16, 64  ;;  %s3116_s29 = scalar_lea.hbm %s4855_s15, 128 }
 0x794   : > { %p3113_p4 = scmp.ne.s32.totalorder %s4805_s16, %s3112_s25  ;;  %p3117_p9 = scmp.lt.s32.totalorder %s4805_s16, %s4855_s15 }
 0x795   : > { %p3118_p10 = scmp.lt.s32.totalorder %s3116_s29, %s3112_s25 }
 0x796   : > { %p3114_p7 = pnand %p3113_p4, %p3280_p5 }
 0x797   : > { %p3119_p11 = por %p3118_p10, %p3117_p9 }
 0x798   : > { %p3115_p8 = pneg %p3114_p7 }
 0x79a   : > { %p3120_p12 = pnand %p3119_p11, %p3115_p8 }
 0x79c   : > { %3123 = shalt.err (!%p3120_p12)
}
 0x79d   : > { %3058 = dma.vmem_to_hbm [thread:$0]  (%p3280_p5), %s2548_s20, 64, %s4805_s16, %s2534_s0  }
 0x79e PF: > { %p3064_p13 = scmp.ge.s32.totalorder %s3158_s21, 2  ;;  %s2559_s22 = sand.u32 1, %s3146_s18  }
 0x79f   : > { %s2560_s23 = scalar_lea.sflag [#allocation5], %s2559_s22 }
 0x7a0   : > { %p3061_p0 = pnand %p3064_p13, %p3284_p6 }
 0x7a2   : > { %p3062_p1 = pneg %p3061_p0 }
 0x7a4   : > { %3141 = dma.done.wait (%p3062_p1), %s2560_s23, 64  }
 0x7a5   : > { %3143 = vsyncadd (%p3062_p1), %s2560_s23, 4294967232  ;;  %s4871_s21 = sld [smem:[#allocation8_spill]]  ;;  %s4874_s18 = smov %s3150_s19 }
 0x7a6   : > { %s4872_s17 = sld [smem:[#allocation7_spill]] }
 0x7a7   : > { %s4873_s20 = sld [smem:[#allocation9_spill]] }
 0x7ab   : > { %p25_p2 = scmp.ge.s32.totalorder %s4871_s21, 4  }
 0x7ac   : > { %s4875_s19 = smov %s4872_s17 }
 0x7ad   :  { %27 = sbr.rel (!%p25_p2) target bundleno = 6 (0x6), region = 125 }
 0x7b2   :  { %2565 = vsyncpa [#allocation5], 1 }
 0x7b3   :  { %2567 = vsyncpa [#allocation5 + $0x1], 1 }

</bundles_post_ra>
